<compile_context>
chip_gen: v7x
topology: tpu7x:2x2x1
jax: 0.10.0
libtpu: 0.0.40
codegen_flags: <defaults>
</compile_context>

<pallas_src>
import jax
import jax.numpy as jnp
from jax.experimental import pallas as pl
from jax.experimental.pallas import tpu as pltpu


KW1, KH2, KW3 = 7, 4, 3          # conv1 kernel (1,7), conv2 (4,1), conv3 (1,3)
POOL_WIN, POOL_STRIDE = 3, 2     # AvgPool2d((1,3), (1,2))


def _round_up(x, m):
    return (x + m - 1) // m * m


def _elu(y):
    # ELU(alpha=1). min() keeps exp() off the (discarded) positive branch.
    return jnp.where(y > 0, y, jnp.exp(jnp.minimum(y, 0.0)) - 1.0)


# --------------------------- fused Pallas kernel ----------------------------

def _make_kernel(BT, Ho2, WA, WP1, WB, WP2, C2, C3, emb):
    G = BT * Ho2                 # independent (sample, conv-height) groups
    KK = KW1 * KH2               # 28  (stage-A im2col contraction)
    K3 = KW3 * C2                # 192 (stage-B im2col contraction)
    p1_need = WB + KW3 - 1       # rows of p1 touched by the stage-B im2col
    inv_win = 1.0 / POOL_WIN

    def kernel(lhs_ref, w12_ref, w3_ref, w4_ref, bias_ref, o_ref, scrA, scrB):
        # ---- stage A: conv1(1,7) ∘ conv2(4,1) + BN1 + ELU, one matmul ----
        lhs = lhs_ref[...].reshape(G * WA, KK)            # aligned collapse
        b12 = bias_ref[0:1, 0:C2]
        a2 = _elu(jnp.dot(lhs, w12_ref[...],
                          preferred_element_type=jnp.float32) + b12)
        scrA[...] = a2.reshape(G, WA, C2)                 # (G, WA, C2)

        # ---- pool1: AvgPool2d((1,3),(1,2)) = 3 stride-2 sublane reads ----
        p1 = (scrA[:, pl.ds(0, WP1, POOL_STRIDE), :] +
              scrA[:, pl.ds(1, WP1, POOL_STRIDE), :] +
              scrA[:, pl.ds(2, WP1, POOL_STRIDE), :]) * inv_win

        # zero-pad p1 rows so stage-B im2col slices stay in range
        pad1 = p1_need - WP1
        if pad1 > 0:
            p1 = jnp.concatenate(
                [p1, jnp.zeros((G, pad1, C2), jnp.float32)], axis=1)

        # ---- stage B: conv3(1,3) + BN2 + ELU, one im2col (lane-concat) matmul
        blhs = jnp.concatenate(
            [p1[:, t:t + WB, :] for t in range(KW3)], axis=-1)  # (G, WB, 192)
        b3 = bias_ref[1:2, 0:C3]
        a3 = _elu(jnp.dot(blhs.reshape(G * WB, K3), w3_ref[...],
                          preferred_element_type=jnp.float32) + b3)
        scrB[...] = a3.reshape(G, WB, C3)                 # (G, WB, C3)

        # ---- pool2 ----
        p2 = (scrB[:, pl.ds(0, WP2, POOL_STRIDE), :] +
              scrB[:, pl.ds(1, WP2, POOL_STRIDE), :] +
              scrB[:, pl.ds(2, WP2, POOL_STRIDE), :]) * inv_win

        # ---- projection: 1x1 conv, batched over all groups/rows ----
        b4 = bias_ref[2:3, 0:emb]
        out = jnp.dot(p2.reshape(G * WP2, C3), w4_ref[...],
                      preferred_element_type=jnp.float32) + b4
        o_ref[...] = out.reshape(BT, Ho2, WP2, emb)

    return kernel


def _fused_patch_embed(lhs, w12, w3, w4, biases, *, Ho2, Wo1, Wp1, Wc3, Wp2,
                       emb):
    """lhs: (b, Ho2, Wo1, 28) im2col of the composed (4,7) conv."""
    b = lhs.shape[0]
    C2 = w12.shape[1]
    C3 = w3.shape[1]
    KK = KW1 * KH2
    K3 = KW3 * C2

    # padded (8-aligned) row counts so in-kernel reshapes are tile-aligned and
    # stride-2 pool reads never leave the scratch buffers.
    WP1 = _round_up(Wp1, 8)
    WP2 = _round_up(Wp2, 8)
    WA = _round_up(max(Wo1, 2 * WP1 + 1), 8)
    WB = _round_up(max(Wc3, 2 * WP2 + 1), 8)

    # pad width rows with zeros (garbage rows stay finite end-to-end)
    lhs = jnp.pad(lhs, ((0, 0), (0, 0), (0, WA - Wo1), (0, 0)))

    # >= 2 grid steps exploits v7x's two TensorCores; otherwise minimize steps.
    num_steps = 2 if b >= 2 else 1
    BT = -(-b // num_steps)
    b_pad = BT * num_steps
    if b_pad > b:
        lhs = jnp.pad(lhs, ((0, b_pad - b), (0, 0), (0, 0), (0, 0)))

    G = BT * Ho2
    kernel = _make_kernel(BT, Ho2, WA, WP1, WB, WP2, C2, C3, emb)

    flops = 2 * b * Ho2 * (Wo1 * KK * C2 + Wc3 * K3 * C3 + Wp2 * C3 * emb)
    transcendentals = b * Ho2 * (Wo1 * C2 + Wc3 * C3)
    bytes_accessed = 4 * (lhs.size + w12.size + w3.size + w4.size
                          + biases.size + b_pad * Ho2 * WP2 * emb)

    out = pl.pallas_call(
        kernel,
        out_shape=jax.ShapeDtypeStruct((b_pad, Ho2, WP2, emb), jnp.float32),
        grid=(num_steps,),
        in_specs=[
            pl.BlockSpec((BT, Ho2, WA, KK), lambda i: (i, 0, 0, 0)),
            pl.BlockSpec((KK, C2), lambda i: (0, 0)),
            pl.BlockSpec((K3, C3), lambda i: (0, 0)),
            pl.BlockSpec((C3, emb), lambda i: (0, 0)),
            pl.BlockSpec(biases.shape, lambda i: (0, 0)),
        ],
        out_specs=pl.BlockSpec((BT, Ho2, WP2, emb), lambda i: (i, 0, 0, 0)),
        scratch_shapes=[
            pltpu.VMEM((G, WA, C2), jnp.float32),
            pltpu.VMEM((G, WB, C3), jnp.float32),
        ],
        compiler_params=pltpu.CompilerParams(
            dimension_semantics=("parallel",)),
        cost_estimate=pl.CostEstimate(
            flops=flops, transcendentals=transcendentals,
            bytes_accessed=bytes_accessed),
    )(lhs, w12, w3, w4, biases)

    # drop batch / row padding, flatten tokens as (h, w) -> h*Wp2 + w
    return out[:b, :, :Wp2, :].reshape(b, Ho2 * Wp2, emb)


# ------------------------------- forward ------------------------------------

def patch_embedding_forward(x, p):
    """x: (b, 1, H, W) NCHW. Returns (b, (H-3)*Wp2, emb)."""
    b, cin, H, W = x.shape
    assert cin == 1 and H >= KH2 and W >= KW1

    # -- plain-JAX parameter folding (tiny tensors; fused away by XLA) --
    w1k = p['w1'][:, 0, 0, :]                          # (64, KW1)
    w2m = p['w2'][:, :, :, 0]                          # (64, 64, KH2)
    s1, t1 = p['bn1_scale'], p['bn1_shift']
    # conv1 ∘ conv2 (no nonlinearity between them), eval-BN1 folded in.
    w12 = (jnp.einsum('ck,ocd->kdo', w1k, w2m)
           .reshape(KW1 * KH2, -1) * s1[None, :])
    b12 = (jnp.einsum('ocd,c->o', w2m, p['b1']) + p['b2']) * s1 + t1

    s2, t2 = p['bn2_scale'], p['bn2_shift']
    w3m = p['w3'][:, :, 0, :]                          # (96, 64, KW3)
    w3 = (jnp.transpose(w3m, (2, 1, 0))
          .reshape(KW3 * w3m.shape[1], -1) * s2[None, :])
    b3 = p['b3'] * s2 + t2

    w4 = p['w4'][:, :, 0, 0].T                         # (96, emb)
    b4 = p['b4']
    emb = w4.shape[1]
    C2, C3 = w12.shape[1], w3.shape[1]

    # -- geometry --
    Wo1 = W - KW1 + 1
    Ho2 = H - KH2 + 1
    Wp1 = (Wo1 - POOL_WIN) // POOL_STRIDE + 1
    Wc3 = Wp1 - KW3 + 1
    Wp2 = (Wc3 - POOL_WIN) // POOL_STRIDE + 1
    assert Wo1 >= POOL_WIN and Wc3 >= POOL_WIN

    # -- im2col for the composed (4,7) conv (tiny; built once in plain JAX) --
    x2 = x[:, 0, :, :]                                 # (b, H, W)
    cols = [x2[:, d:d + Ho2, k:k + Wo1]
            for k in range(KW1) for d in range(KH2)]   # order = k*KH2 + d
    lhs = jnp.stack(cols, axis=-1)                     # (b, Ho2, Wo1, 28)

    # pack the three biases into one input array (fewer DMA descriptors)
    bmax = max(C2, C3, emb)
    biases = jnp.zeros((3, bmax), jnp.float32)
    biases = biases.at[0, :C2].set(b12).at[1, :C3].set(b3).at[2, :emb].set(b4)

    return _fused_patch_embed(lhs, w12, w3, w4, biases, Ho2=Ho2, Wo1=Wo1,
                              Wp1=Wp1, Wc3=Wc3, Wp2=Wp2, emb=emb)


# ----------------------------- parameters -----------------------------------

def init_params(key, emb_size=128):
    ks = jax.random.split(key, 6)

    def conv_init(k, co, ci, kh, kw):
        fan_in = ci * kh * kw
        bound = 1.0 / jnp.sqrt(jnp.float32(fan_in))
        kw_, kb_ = jax.random.split(k)
        w = jax.random.uniform(kw_, (co, ci, kh, kw), jnp.float32, -bound, bound)
        b = jax.random.uniform(kb_, (co,), jnp.float32, -bound, bound)
        return w, b

    def bn_init(k, c, eps=1e-5):
        k1, k2, k3, k4 = jax.random.split(k, 4)
        gamma = 1.0 + 0.1 * jax.random.normal(k1, (c,), jnp.float32)
        beta = 0.1 * jax.random.normal(k2, (c,), jnp.float32)
        mean = 0.1 * jax.random.normal(k3, (c,), jnp.float32)
        var = 1.0 + 0.1 * jax.random.uniform(k4, (c,), jnp.float32)
        scale = gamma / jnp.sqrt(var + eps)
        shift = beta - mean * scale
        return scale, shift

    w1, b1 = conv_init(ks[0], 64, 1, 1, 7)
    w2, b2 = conv_init(ks[1], 64, 64, 4, 1)
    w3, b3 = conv_init(ks[2], 96, 64, 1, 3)
    w4, b4 = conv_init(ks[3], emb_size, 96, 1, 1)
    bn1_s, bn1_b = bn_init(ks[4], 64)
    bn2_s, bn2_b = bn_init(ks[5], 96)
    return dict(w1=w1, b1=b1, w2=w2, b2=b2, w3=w3, b3=b3, w4=w4, b4=b4,
                bn1_scale=bn1_s, bn1_shift=bn1_b,
                bn2_scale=bn2_s, bn2_shift=bn2_b)


# --------------------------- pure-JAX reference -----------------------------

def reference_forward(x, p):
    def conv(x, w, b):
        y = jax.lax.conv_general_dilated(
            x, w, (1, 1), 'VALID', dimension_numbers=('NCHW', 'OIHW', 'NCHW'))
        return y + b[None, :, None, None]

    def bn_elu_ref(x, scale, shift):
        y = x * scale[None, :, None, None] + shift[None, :, None, None]
        return jnp.where(y > 0, y, jnp.exp(y) - 1.0)

    def pool(x):
        s = jax.lax.reduce_window(x, 0.0, jax.lax.add,
                                  (1, 1, 1, 3), (1, 1, 1, 2), 'VALID')
        return s / 3.0

    x = conv(x, p['w1'], p['b1'])
    x = bn_elu_ref(conv(x, p['w2'], p['b2']), p['bn1_scale'], p['bn1_shift'])
    x = pool(x)
    x = bn_elu_ref(conv(x, p['w3'], p['b3']), p['bn2_scale'], p['bn2_shift'])
    x = pool(x)
    x = conv(x, p['w4'], p['b4'])
    b_, e_, h_, w_ = x.shape
    return x.reshape(b_, e_, h_ * w_).transpose(0, 2, 1)


# --------------------------------- main --------------------------------------

if __name__ == "__main__":
    key = jax.random.PRNGKey(0)
    kx, kp = jax.random.split(key)

    EMB = 128                       # module default emb_size (lane-dense output)
    # (b, c=1, H, W); H=5 exercises the Ho2=2 path, W=33 -> 5 tokens per row.
    x = jax.random.normal(kx, (8, 1, 5, 33), jnp.float32)
    params = init_params(kp, EMB)

    out = jax.block_until_ready(jax.jit(patch_embedding_forward)(x, params))

    # width 33 -> 27 -> pool 13 -> conv 11 -> pool 5; height 5 -> 2
    assert out.shape == (8, 2 * 5, EMB), out.shape

    ref = jax.block_until_ready(reference_forward(x, params))
    assert jnp.allclose(out, ref, atol=1e-4, rtol=1e-4), float(
        jnp.max(jnp.abs(out - ref)))

    print("KERNEL_OK")
</pallas_src>

<mosaic_0001>
module attributes {stable_mosaic.version = 11 : i64} {
  func.func @kernel(%arg0: i32, %arg1: memref<4x2x40x28xf32, #tpu.memory_space<vmem>>, %arg2: memref<28x64xf32, #tpu.memory_space<vmem>>, %arg3: memref<192x96xf32, #tpu.memory_space<vmem>>, %arg4: memref<96x128xf32, #tpu.memory_space<vmem>>, %arg5: memref<3x128xf32, #tpu.memory_space<vmem>>, %arg6: memref<4x2x8x128xf32, #tpu.memory_space<vmem>>, %arg7: memref<8x40x64xf32, #tpu.memory_space<vmem>>, %arg8: memref<8x24x96xf32, #tpu.memory_space<vmem>>) attributes {dimension_semantics = [#tpu.dimension_semantics<parallel>], iteration_bounds = array<i64: 2>, scalar_prefetch = 0 : i64, scratch_operands = 2 : i64, tpu.core_type = #tpu.core_type<tc>, window_params = [{transform_indices = @transform_0, window_bounds = array<i64: 4, 2, 40, 28>}, {pipeline_mode = #tpu.pipeline_mode<synchronous>, transform_indices = @transform_1, window_bounds = array<i64: 28, 64>}, {pipeline_mode = #tpu.pipeline_mode<synchronous>, transform_indices = @transform_2, window_bounds = array<i64: 192, 96>}, {pipeline_mode = #tpu.pipeline_mode<synchronous>, transform_indices = @transform_3, window_bounds = array<i64: 96, 128>}, {pipeline_mode = #tpu.pipeline_mode<synchronous>, transform_indices = @transform_4, window_bounds = array<i64: 3, 128>}, {transform_indices = @transform_5, window_bounds = array<i64: 4, 2, 8, 128>}]} {
    %c0 = arith.constant 0 : index
    %c0_0 = arith.constant 0 : index
    %c0_1 = arith.constant 0 : index
    %c0_2 = arith.constant 0 : index
    %0 = vector.load %arg1[%c0, %c0_0, %c0_1, %c0_2] : memref<4x2x40x28xf32, #tpu.memory_space<vmem>>, vector<4x2x40x28xf32>
    %1 = vector.shape_cast %0 : vector<4x2x40x28xf32> to vector<320x28xf32>
    %c0_3 = arith.constant 0 : index
    %c0_4 = arith.constant 0 : index
    %2 = vector.load %arg5[%c0_3, %c0_4] : memref<3x128xf32, #tpu.memory_space<vmem>>, vector<1x64xf32>
    %c0_5 = arith.constant 0 : index
    %c0_6 = arith.constant 0 : index
    %3 = vector.load %arg2[%c0_5, %c0_6] : memref<28x64xf32, #tpu.memory_space<vmem>>, vector<28x64xf32>
    %cst = arith.constant dense<0.000000e+00> : vector<320x64xf32>
    %4 = tpu.matmul %1, %3, %cst {dimension_numbers = #tpu.dot_dimension_numbers<[1], [0], [0], [1], [0, 0, 1, 1], [], []>} : vector<320x28xf32>, vector<28x64xf32>, vector<320x64xf32> -> vector<320x64xf32>
    %5 = vector.broadcast %2 : vector<1x64xf32> to vector<320x64xf32>
    %6 = arith.addf %4, %5 : vector<320x64xf32>
    %cst_7 = arith.constant 0.000000e+00 : f32
    %7 = vector.broadcast %cst_7 : f32 to vector<320x64xf32>
    %8 = arith.cmpf ogt, %6, %7 : vector<320x64xf32>
    %cst_8 = arith.constant 0.000000e+00 : f32
    %9 = vector.broadcast %cst_8 : f32 to vector<320x64xf32>
    %10 = arith.minimumf %6, %9 : vector<320x64xf32>
    %11 = math.exp %10 : vector<320x64xf32>
    %cst_9 = arith.constant 1.000000e+00 : f32
    %12 = vector.broadcast %cst_9 : f32 to vector<320x64xf32>
    %13 = arith.subf %11, %12 : vector<320x64xf32>
    %14 = arith.select %8, %6, %13 : vector<320x64xi1>, vector<320x64xf32>
    %15 = vector.shape_cast %14 : vector<320x64xf32> to vector<8x40x64xf32>
    %c0_10 = arith.constant 0 : index
    %c0_11 = arith.constant 0 : index
    %c0_12 = arith.constant 0 : index
    %16 = vector.load %arg7[%c0_10, %c0_11, %c0_12] : memref<8x40x64xf32, #tpu.memory_space<vmem>>, vector<8x40x64xf32>
    tpu.vector_store %arg7[%c0_10, %c0_11, %c0_12], %15 {strides = array<i32>} : memref<8x40x64xf32, #tpu.memory_space<vmem>>, vector<8x40x64xf32>,
    %c0_13 = arith.constant 0 : index
    %c0_14 = arith.constant 0 : index
    %c0_15 = arith.constant 0 : index
    %17 = tpu.strided_load %arg7[%c0_13, %c0_14, %c0_15] {strides = array<i32: 1, 2, 1>} : memref<8x40x64xf32, #tpu.memory_space<vmem>>, vector<8x16x64xf32>
    %c0_16 = arith.constant 0 : index
    %c1 = arith.constant 1 : index
    %c0_17 = arith.constant 0 : index
    %18 = tpu.strided_load %arg7[%c0_16, %c1, %c0_17] {strides = array<i32: 1, 2, 1>} : memref<8x40x64xf32, #tpu.memory_space<vmem>>, vector<8x16x64xf32>
    %19 = arith.addf %17, %18 : vector<8x16x64xf32>
    %c0_18 = arith.constant 0 : index
    %c2 = arith.constant 2 : index
    %c0_19 = arith.constant 0 : index
    %20 = tpu.strided_load %arg7[%c0_18, %c2, %c0_19] {strides = array<i32: 1, 2, 1>} : memref<8x40x64xf32, #tpu.memory_space<vmem>>, vector<8x16x64xf32>
    %21 = arith.addf %19, %20 : vector<8x16x64xf32>
    %cst_20 = arith.constant 0.333333343 : f32
    %22 = vector.broadcast %cst_20 : f32 to vector<8x16x64xf32>
    %23 = arith.mulf %21, %22 : vector<8x16x64xf32>
    %cst_21 = arith.constant 0.000000e+00 : f32
    %24 = vector.broadcast %cst_21 : f32 to vector<8x10x64xf32>
    %25 = tpu.concatenate %23, %24 in 1 : vector<8x16x64xf32>, vector<8x10x64xf32> -> vector<8x26x64xf32>
    %26 = vector.extract_strided_slice %25 {offsets = [0, 0, 0], sizes = [8, 24, 64], strides = [1, 1, 1]} : vector<8x26x64xf32> to vector<8x24x64xf32>
    %27 = vector.extract_strided_slice %25 {offsets = [0, 1, 0], sizes = [8, 24, 64], strides = [1, 1, 1]} : vector<8x26x64xf32> to vector<8x24x64xf32>
    %28 = vector.extract_strided_slice %25 {offsets = [0, 2, 0], sizes = [8, 24, 64], strides = [1, 1, 1]} : vector<8x26x64xf32> to vector<8x24x64xf32>
    %29 = tpu.concatenate %26, %27, %28 in 2 : vector<8x24x64xf32>, vector<8x24x64xf32>, vector<8x24x64xf32> -> vector<8x24x192xf32>
    %c1_22 = arith.constant 1 : index
    %c0_23 = arith.constant 0 : index
    %30 = vector.load %arg5[%c1_22, %c0_23] : memref<3x128xf32, #tpu.memory_space<vmem>>, vector<1x96xf32>
    %31 = vector.shape_cast %29 : vector<8x24x192xf32> to vector<192x192xf32>
    %c0_24 = arith.constant 0 : index
    %c0_25 = arith.constant 0 : index
    %32 = vector.load %arg3[%c0_24, %c0_25] : memref<192x96xf32, #tpu.memory_space<vmem>>, vector<192x96xf32>
    %cst_26 = arith.constant dense<0.000000e+00> : vector<192x96xf32>
    %33 = tpu.matmul %31, %32, %cst_26 {dimension_numbers = #tpu.dot_dimension_numbers<[1], [0], [0], [1], [0, 0, 1, 1], [], []>} : vector<192x192xf32>, vector<192x96xf32>, vector<192x96xf32> -> vector<192x96xf32>
    %34 = vector.broadcast %30 : vector<1x96xf32> to vector<192x96xf32>
    %35 = arith.addf %33, %34 : vector<192x96xf32>
    %cst_27 = arith.constant 0.000000e+00 : f32
    %36 = vector.broadcast %cst_27 : f32 to vector<192x96xf32>
    %37 = arith.cmpf ogt, %35, %36 : vector<192x96xf32>
    %cst_28 = arith.constant 0.000000e+00 : f32
    %38 = vector.broadcast %cst_28 : f32 to vector<192x96xf32>
    %39 = arith.minimumf %35, %38 : vector<192x96xf32>
    %40 = math.exp %39 : vector<192x96xf32>
    %cst_29 = arith.constant 1.000000e+00 : f32
    %41 = vector.broadcast %cst_29 : f32 to vector<192x96xf32>
    %42 = arith.subf %40, %41 : vector<192x96xf32>
    %43 = arith.select %37, %35, %42 : vector<192x96xi1>, vector<192x96xf32>
    %44 = vector.shape_cast %43 : vector<192x96xf32> to vector<8x24x96xf32>
    %c0_30 = arith.constant 0 : index
    %c0_31 = arith.constant 0 : index
    %c0_32 = arith.constant 0 : index
    %45 = vector.load %arg8[%c0_30, %c0_31, %c0_32] : memref<8x24x96xf32, #tpu.memory_space<vmem>>, vector<8x24x96xf32>
    tpu.vector_store %arg8[%c0_30, %c0_31, %c0_32], %44 {strides = array<i32>} : memref<8x24x96xf32, #tpu.memory_space<vmem>>, vector<8x24x96xf32>,
    %c0_33 = arith.constant 0 : index
    %c0_34 = arith.constant 0 : index
    %c0_35 = arith.constant 0 : index
    %46 = tpu.strided_load %arg8[%c0_33, %c0_34, %c0_35] {strides = array<i32: 1, 2, 1>} : memref<8x24x96xf32, #tpu.memory_space<vmem>>, vector<8x8x96xf32>
    %c0_36 = arith.constant 0 : index
    %c1_37 = arith.constant 1 : index
    %c0_38 = arith.constant 0 : index
    %47 = tpu.strided_load %arg8[%c0_36, %c1_37, %c0_38] {strides = array<i32: 1, 2, 1>} : memref<8x24x96xf32, #tpu.memory_space<vmem>>, vector<8x8x96xf32>
    %48 = arith.addf %46, %47 : vector<8x8x96xf32>
    %c0_39 = arith.constant 0 : index
    %c2_40 = arith.constant 2 : index
    %c0_41 = arith.constant 0 : index
    %49 = tpu.strided_load %arg8[%c0_39, %c2_40, %c0_41] {strides = array<i32: 1, 2, 1>} : memref<8x24x96xf32, #tpu.memory_space<vmem>>, vector<8x8x96xf32>
    %50 = arith.addf %48, %49 : vector<8x8x96xf32>
    %cst_42 = arith.constant 0.333333343 : f32
    %51 = vector.broadcast %cst_42 : f32 to vector<8x8x96xf32>
    %52 = arith.mulf %50, %51 : vector<8x8x96xf32>
    %c2_43 = arith.constant 2 : index
    %c0_44 = arith.constant 0 : index
    %53 = vector.load %arg5[%c2_43, %c0_44] : memref<3x128xf32, #tpu.memory_space<vmem>>, vector<1x128xf32>
    %54 = vector.shape_cast %52 : vector<8x8x96xf32> to vector<64x96xf32>
    %c0_45 = arith.constant 0 : index
    %c0_46 = arith.constant 0 : index
    %55 = vector.load %arg4[%c0_45, %c0_46] : memref<96x128xf32, #tpu.memory_space<vmem>>, vector<96x128xf32>
    %cst_47 = arith.constant dense<0.000000e+00> : vector<64x128xf32>
    %56 = tpu.matmul %54, %55, %cst_47 {dimension_numbers = #tpu.dot_dimension_numbers<[1], [0], [0], [1], [0, 0, 1, 1], [], []>} : vector<64x96xf32>, vector<96x128xf32>, vector<64x128xf32> -> vector<64x128xf32>
    %57 = vector.broadcast %53 : vector<1x128xf32> to vector<64x128xf32>
    %58 = arith.addf %56, %57 : vector<64x128xf32>
    %59 = vector.shape_cast %58 : vector<64x128xf32> to vector<4x2x8x128xf32>
    %c0_48 = arith.constant 0 : index
    %c0_49 = arith.constant 0 : index
    %c0_50 = arith.constant 0 : index
    %c0_51 = arith.constant 0 : index
    %60 = vector.load %arg6[%c0_48, %c0_49, %c0_50, %c0_51] : memref<4x2x8x128xf32, #tpu.memory_space<vmem>>, vector<4x2x8x128xf32>
    tpu.vector_store %arg6[%c0_48, %c0_49, %c0_50, %c0_51], %59 {strides = array<i32>} : memref<4x2x8x128xf32, #tpu.memory_space<vmem>>, vector<4x2x8x128xf32>,
    return
  }
  func.func @transform_0(%arg0: i32) -> (i32, i32, i32, i32) {
    %c0_i32 = arith.constant 0 : i32
    %c0_i32_0 = arith.constant 0 : i32
    %c0_i32_1 = arith.constant 0 : i32
    %c0_i32_2 = arith.constant 0 : i32
    return %arg0, %c0_i32, %c0_i32_0, %c0_i32_1 : i32, i32, i32, i32
  }
  func.func @transform_1(%arg0: i32) -> (i32, i32) {
    %c0_i32 = arith.constant 0 : i32
    %c0_i32_0 = arith.constant 0 : i32
    %c0_i32_1 = arith.constant 0 : i32
    return %c0_i32, %c0_i32_0 : i32, i32
  }
  func.func @transform_2(%arg0: i32) -> (i32, i32) {
    %c0_i32 = arith.constant 0 : i32
    %c0_i32_0 = arith.constant 0 : i32
    %c0_i32_1 = arith.constant 0 : i32
    return %c0_i32, %c0_i32_0 : i32, i32
  }
  func.func @transform_3(%arg0: i32) -> (i32, i32) {
    %c0_i32 = arith.constant 0 : i32
    %c0_i32_0 = arith.constant 0 : i32
    %c0_i32_1 = arith.constant 0 : i32
    return %c0_i32, %c0_i32_0 : i32, i32
  }
  func.func @transform_4(%arg0: i32) -> (i32, i32) {
    %c0_i32 = arith.constant 0 : i32
    %c0_i32_0 = arith.constant 0 : i32
    %c0_i32_1 = arith.constant 0 : i32
    return %c0_i32, %c0_i32_0 : i32, i32
  }
  func.func @transform_5(%arg0: i32) -> (i32, i32, i32, i32) {
    %c0_i32 = arith.constant 0 : i32
    %c0_i32_0 = arith.constant 0 : i32
    %c0_i32_1 = arith.constant 0 : i32
    %c0_i32_2 = arith.constant 0 : i32
    return %arg0, %c0_i32, %c0_i32_0, %c0_i32_1 : i32, i32, i32, i32
  }
}

</mosaic_0001>

<bundles_post_ra>
// kernel: patch_embedding_forward.1
= control target key start
LH: loop header
LB: loop body
LE: loop exit
PB: predicated region body
PF: predicated region fallthrough
CT: control target
= control target key end

     0   :  { %s2541_s18 = smov 0   ;;  %s3416_s0 = inlined_call_operand.vmem [shape: f32[8,2,40,28], index: 0, kind: input, shape index: {}]   ;;  %s3417_s1 = inlined_call_operand.vmem [shape: f32[28,64], index: 1, kind: input, shape index: {}]   ;;  %s3418_s2 = inlined_call_operand.vmem [shape: f32[192,96], index: 2, kind: input, shape index: {}]   ;;  %s3419_s3 = inlined_call_operand.vmem [shape: f32[96,128], index: 3, kind: input, shape index: {}]   ;;  %s3420_s4 = inlined_call_operand.vmem [shape: f32[3,128], index: 4, kind: input, shape index: {}]   ;;  %s3421_s5 = inlined_call_operand.vmem [shape: f32[8,2,8,128], index: 5, kind: output, shape index: {}]  }
   0x1 LB: > { %s1951_s19 = sadd.s32 4294967295, %s2505_s18   ;;  %p1955_p0 = scmp.ge.s32.totalorder %s2505_s18, 1  ;;  %s2505_s18 = sphi %s2541_s18, %s15_s18  }
   0x2   : > { %p189_p1 = scmp.lt.s32.totalorder %s2505_s18, 3 }
   0x4   : > { %p190_p2 = pnand %p1955_p0, %p189_p1 }
   0x5   : > { %v274_v0 = vld [vmem:[%s3417_s1] sm:$0xff] (!%p190_p2)  ;;  %v275_v1 = vld [vmem:[%s3417_s1 + $0x8] sm:$0xff] (!%p190_p2)  ;;  %v276_v2 = vld [vmem:[%s3417_s1 + $0x10] sm:$0xff] (!%p190_p2)  ;;  %vm403_vm0 = vcmask (!%p190_p2), 1043456   ;;  %s1956_s26 = sshll.u32 (!%p190_p2), %s1951_s19, 2  ;;  %vm2507_vm1 = vmmov (!%p190_p2), 1  }
   0x6   : > { %193 = sbr.rel (%p190_p2) target bundleno = 953 (0x3b9), region = 40  ;;  %v2288_v3 = vpack.c.bf16 (!%p190_p2), %v275_v1, %v274_v0  ;;  %v277_v4 = vld [vmem:[%s3417_s1 + $0x18] sm:$0xf] (!%p190_p2)  ;;  %p220_p3 = scmp.lt.s32.totalorder (!%p190_p2), %s1956_s26, 7  ;;  %vm2293_vm2 = vmpackc.low (!%p190_p2), %vm403_vm0, %vm2507_vm1  ;;  %vm282_vm3 = vcmask (!%p190_p2), 228352   ;;  %v2508_v46 = vmov (!%p190_p2), 0.0  }
   0x7   : > { %v2292_v5 = vpack.c.bf16 (!%p190_p2), %v277_v4, %v276_v2  ;;  %v2650_v47 = vrot.slane (!%p190_p2), %v2508_v46, 1  ;;  %s2509_s8 = smov (!%p190_p2), 64   ;;  %v1252_v48 = vld [vmem:[%s3418_s2] sm:$0xff] (!%p190_p2)  ;;  %v1253_v49 = vld [vmem:[%s3418_s2 + $0x8] sm:$0xff] (!%p190_p2)  ;;  %v2510_v50 = vmov (!%p190_p2), 0.0|0.0   ;;  %v1254_v52 = vld [vmem:[%s3418_s2 + $0x10] sm:$0xff] (!%p190_p2) }
   0x8   : > { %2289 = vmatprep.subr.bf16.mxu0 (!%p190_p2), %v2288_v3  ;;  %2298 = vmatprep.subr.bf16.mxu1 (!%p190_p2), %v2510_v50  ;;  %v2299_v51 = vpack.c.bf16 (!%p190_p2), %v1253_v49, %v1252_v48  ;;  %v1255_v53 = vld [vmem:[%s3418_s2 + $0x18] sm:$0xff] (!%p190_p2)  ;;  %v1256_v54 = vld [vmem:[%s3418_s2 + $0x20] sm:$0xff] (!%p190_p2)  ;;  %v1257_v56 = vld [vmem:[%s3418_s2 + $0x28] sm:$0xff] (!%p190_p2)  ;;  %vm912_vm4 = vcmask (!%p190_p2), 523264  }
   0x9   : > { %2291 = vmatpush3.bf16.msra.mxu0 (!%p190_p2), %v2288_v3  ;;  %1152 = vrot.lane.b32.xlu1 (!%p190_p2), %v2650_v47, %s2509_s8  ;;  %v2302_v55 = vpack.c.bf16 (!%p190_p2), %v1255_v53, %v1254_v52  ;;  %v2305_v57 = vpack.c.bf16 (!%p190_p2), %v1257_v56, %v1256_v54  ;;  %v1258_v58 = vld [vmem:[%s3418_s2 + $0x30] sm:$0xff] (!%p190_p2)  ;;  %v1259_v59 = vld [vmem:[%s3418_s2 + $0x38] sm:$0xff] (!%p190_p2)  ;;  %v2684_v60 = vld [vmem:[%s3420_s4] ss:$0 sm:$0xff] (!%p190_p2) }
   0xa   : > { %2294 = vmatprep.subr.msk.bf16.mxu0 (!%p190_p2), %vm2293_vm2, %v2292_v5  ;;  %2300 = vmatpush1.bf16.msra.mxu1 (!%p190_p2), %v2299_v51  ;;  %v2308_v62 = vpack.c.bf16 (!%p190_p2), %v1259_v59, %v1258_v58  ;;  %v1260_v1 = vld [vmem:[%s3418_s2 + $0x40] sm:$0xff] (!%p190_p2)  ;;  %v1261_v2 = vld [vmem:[%s3418_s2 + $0x48] sm:$0xff] (!%p190_p2)  ;;  %v1271_v58 = vld [vmem:[%s3418_s2 + $0x98] sm:$0xff] (!%p190_p2) }
   0xb   : > { %2301 = vmatprep.subr.bf16.mxu1 (!%p190_p2), %v2510_v50 }
   0xd   : > { %s3425_s26 = smov (!%p220_p3, %s1956_s26), 7  ;;  %2297 = vmatpush3.bf16.msk.msra.mxu0 %vm2293_vm2, %v2292_v5 }
   0xe   : > { %s2358_s29 = smul.u32 80, %s3425_s26  ;;  %2303 = vmatpush1.bf16.msra.mxu1 %v2302_v55  ;;  %s2119_s17 = sshll.u32 %s3425_s26, 4 }
   0xf   : > { %2304 = vmatprep.subr.bf16.mxu1 %v2510_v50  ;;  %s231_s23 = scalar_lea.vmem %s3421_s5, %s2119_s17 }
  0x10   : > { %s2567_s7 = scalar_lea.vmem %s3416_s0, %s2358_s29 }
  0x11   : > { %v233_v6 = vld [vmem:[%s2567_s7] sm:$0xff]  ;;  %v234_v7 = vld [vmem:[%s2567_s7 + $0x8] sm:$0xff]  ;;  %v235_v8 = vld [vmem:[%s2567_s7 + $0x10] sm:$0xff] }
  0x12   : > { %2192 = vmatprep.mubr.msk.f32.mxu0 %vm282_vm3, %v233_v6  ;;  %v236_v9 = vld [vmem:[%s2567_s7 + $0x18] sm:$0xff]  ;;  %v237_v10 = vld [vmem:[%s2567_s7 + $0x20] sm:$0xff]  ;;  %v238_v11 = vld [vmem:[%s2567_s7 + $0x28] sm:$0xff]  ;;  %2306 = vmatpush1.bf16.msra.mxu1 %v2305_v57 }
  0x13   : > { %2193 = vmatmul.mubr.msk.f32.vlgmr.msra.gmra.mrb[0].mxu0 %vm282_vm3, %v234_v7  ;;  %v239_v12 = vld [vmem:[%s2567_s7 + $0x30] sm:$0xff]  ;;  %v240_v13 = vld [vmem:[%s2567_s7 + $0x38] sm:$0xff]  ;;  %v241_v14 = vld [vmem:[%s2567_s7 + $0x40] sm:$0xff]  ;;  %2307 = vmatprep.subr.bf16.mxu1 %v2510_v50  ;;  %v2311_v7 = vpack.c.bf16 %v1261_v2, %v1260_v1 }
  0x14   : > { %2195 = vmatprep.mubr.msk.f32.mxu0 %vm282_vm3, %v235_v8  ;;  %v242_v15 = vld [vmem:[%s2567_s7 + $0x48] sm:$0xff]  ;;  %v243_v16 = vld [vmem:[%s2567_s7 + $0x50] sm:$0xff]  ;;  %v244_v17 = vld [vmem:[%s2567_s7 + $0x58] sm:$0xff] }
  0x15   : > { %v245_v18 = vld [vmem:[%s2567_s7 + $0x60] sm:$0xff]  ;;  %v246_v19 = vld [vmem:[%s2567_s7 + $0x68] sm:$0xff]  ;;  %v247_v20 = vld [vmem:[%s2567_s7 + $0x70] sm:$0xff] }
  0x16   : > { %v248_v21 = vld [vmem:[%s2567_s7 + $0x78] sm:$0xff]  ;;  %v249_v22 = vld [vmem:[%s2567_s7 + $0x80] sm:$0xff]  ;;  %v250_v23 = vld [vmem:[%s2567_s7 + $0x88] sm:$0xff]  ;;  %2309 = vmatpush1.bf16.msra.mxu1 %v2308_v62 }
  0x17   : > { %2196 = vmatmul.mubr.msk.f32.gmra.mrb[2].mxu0 %vm282_vm3, %v236_v9  ;;  %v251_v24 = vld [vmem:[%s2567_s7 + $0x90] sm:$0xff]  ;;  %v252_v25 = vld [vmem:[%s2567_s7 + $0x98] sm:$0xff]  ;;  %v253_v26 = vld [vmem:[%s2567_s7 + $0xa0] sm:$0xff]  ;;  %2310 = vmatprep.subr.bf16.mxu1 %v2510_v50 }
  0x18   : > { %2198 = vmatprep.mubr.msk.f32.mxu0 %vm282_vm3, %v237_v10  ;;  %v254_v27 = vld [vmem:[%s2567_s7 + $0xa8] sm:$0xff]  ;;  %v255_v28 = vld [vmem:[%s2567_s7 + $0xb0] sm:$0xff]  ;;  %v256_v29 = vld [vmem:[%s2567_s7 + $0xb8] sm:$0xff] }
  0x19   : > { %v257_v30 = vld [vmem:[%s2567_s7 + $0xc0] sm:$0xff]  ;;  %v258_v31 = vld [vmem:[%s2567_s7 + $0xc8] sm:$0xff]  ;;  %v259_v32 = vld [vmem:[%s2567_s7 + $0xd0] sm:$0xff] }
  0x1a   : > { %v260_v33 = vld [vmem:[%s2567_s7 + $0xd8] sm:$0xff]  ;;  %v261_v34 = vld [vmem:[%s2567_s7 + $0xe0] sm:$0xff]  ;;  %v262_v35 = vld [vmem:[%s2567_s7 + $0xe8] sm:$0xff]  ;;  %2312 = vmatpush1.bf16.msra.mxu1 %v2311_v7 }
  0x1b   : > { %2199 = vmatmul.mubr.msk.f32.gmra.mrb[4].mxu0 %vm282_vm3, %v238_v11  ;;  %v263_v36 = vld [vmem:[%s2567_s7 + $0xf0] sm:$0xff]  ;;  %v264_v37 = vld [vmem:[%s2567_s7 + $0xf8] sm:$0xff]  ;;  %v265_v38 = vld [vmem:[%s2567_s7 + $0x100] sm:$0xff]  ;;  %2313 = vmatprep.subr.bf16.mxu1 %v2510_v50 }
  0x1c   : > { %2201 = vmatprep.mubr.msk.f32.mxu0 %vm282_vm3, %v239_v12  ;;  %v266_v39 = vld [vmem:[%s2567_s7 + $0x108] sm:$0xff]  ;;  %v267_v40 = vld [vmem:[%s2567_s7 + $0x110] sm:$0xff]  ;;  %v268_v41 = vld [vmem:[%s2567_s7 + $0x118] sm:$0xff] }
  0x1d   : > { %v269_v42 = vld [vmem:[%s2567_s7 + $0x120] sm:$0xff]  ;;  %v270_v43 = vld [vmem:[%s2567_s7 + $0x128] sm:$0xff]  ;;  %v271_v44 = vld [vmem:[%s2567_s7 + $0x130] sm:$0xff] }
  0x1e   : > { %v272_v45 = vld [vmem:[%s2567_s7 + $0x138] sm:$0xff]  ;;  %v1262_v11 = vld [vmem:[%s3418_s2 + $0x50] sm:$0xff] }
  0x1f   : > { %2202 = vmatmul.mubr.msk.f32.gmra.mrb[6].mxu0 %vm282_vm3, %v240_v13  ;;  %v1263_v12 = vld [vmem:[%s3418_s2 + $0x58] sm:$0xff]  ;;  %v1270_v57 = vld [vmem:[%s3418_s2 + $0x90] sm:$0xff] }
  0x20   : > { %2204 = vmatprep.mubr.msk.f32.mxu0 %vm282_vm3, %v241_v14 }
  0x23   : > { %2205 = vmatmul.mubr.msk.f32.gmra.mrb[8].mxu0 %vm282_vm3, %v242_v15 }
  0x24   : > { %2207 = vmatprep.mubr.msk.f32.mxu0 %vm282_vm3, %v243_v16 }
  0x27   : > { %2208 = vmatmul.mubr.msk.f32.gmra.mrb[10].mxu0 %vm282_vm3, %v244_v17 }
  0x28   : > { %2210 = vmatprep.mubr.msk.f32.mxu0 %vm282_vm3, %v245_v18  ;;  %v2314_v18 = vpack.c.bf16 %v1263_v12, %v1262_v11  ;;  %v1273_v11 = vld [vmem:[%s3418_s2 + $0xa8] sm:$0xff] }
  0x2a   : > { %2315 = vmatpush1.bf16.msra.mxu1 %v2314_v18 }
  0x2b   : > { %2211 = vmatmul.mubr.msk.f32.gmra.mrb[12].mxu0 %vm282_vm3, %v246_v19  ;;  %2316 = vmatprep.subr.bf16.mxu1 %v2510_v50 }
  0x2c   : > { %2213 = vmatprep.mubr.msk.f32.mxu0 %vm282_vm3, %v247_v20 }
  0x2f   : > { %2214 = vmatmul.mubr.msk.f32.gmra.mrb[14].mxu0 %vm282_vm3, %v248_v21 }
  0x30   : > { %2216 = vmatprep.mubr.msk.f32.mxu0 %vm282_vm3, %v249_v22  ;;  %v1264_v22 = vld [vmem:[%s3418_s2 + $0x60] sm:$0xff] }
  0x33   : > { %2217 = vmatmul.mubr.msk.f32.gmra.mrb[16].mxu0 %vm282_vm3, %v250_v23  ;;  %v1265_v23 = vld [vmem:[%s3418_s2 + $0x68] sm:$0xff] }
  0x34   : > { %2219 = vmatprep.mubr.msk.f32.mxu0 %vm282_vm3, %v251_v24 }
  0x37   : > { %2220 = vmatmul.mubr.msk.f32.gmra.mrb[18].mxu0 %vm282_vm3, %v252_v25 }
  0x38   : > { %2222 = vmatprep.mubr.msk.f32.mxu0 %vm282_vm3, %v253_v26 }
  0x3b   : > { %2223 = vmatmul.mubr.msk.f32.gmra.mrb[20].mxu0 %vm282_vm3, %v254_v27 }
  0x3c   : > { %2225 = vmatprep.mubr.msk.f32.mxu0 %vm282_vm3, %v255_v28 }
  0x3f   : > { %2226 = vmatmul.mubr.msk.f32.gmra.mrb[22].mxu0 %vm282_vm3, %v256_v29  ;;  %v2317_v29 = vpack.c.bf16 %v1265_v23, %v1264_v22 }
  0x40   : > { %2228 = vmatprep.mubr.msk.f32.mxu0 %vm282_vm3, %v257_v30 }
  0x41   : > { %2318 = vmatpush1.bf16.msra.mxu1 %v2317_v29 }
  0x42   : > { %2319 = vmatprep.subr.bf16.mxu1 %v2510_v50 }
  0x43   : > { %2229 = vmatmul.mubr.msk.f32.gmra.mrb[24].mxu0 %vm282_vm3, %v258_v31 }
  0x44   : > { %2231 = vmatprep.mubr.msk.f32.mxu0 %vm282_vm3, %v259_v32 }
  0x47   : > { %2232 = vmatmul.mubr.msk.f32.gmra.mrb[26].mxu0 %vm282_vm3, %v260_v33  ;;  %v1266_v33 = vld [vmem:[%s3418_s2 + $0x70] sm:$0xff] }
  0x48   : > { %2234 = vmatprep.mubr.msk.f32.mxu0 %vm282_vm3, %v261_v34  ;;  %v1267_v34 = vld [vmem:[%s3418_s2 + $0x78] sm:$0xff] }
  0x4b   : > { %2235 = vmatmul.mubr.msk.f32.gmra.mrb[28].mxu0 %vm282_vm3, %v262_v35 }
  0x4c   : > { %2237 = vmatprep.mubr.msk.f32.mxu0 %vm282_vm3, %v263_v36 }
  0x4f   : > { %2238 = vmatmul.mubr.msk.f32.gmra.mrb[30].mxu0 %vm282_vm3, %v264_v37 }
  0x50   : > { %2240 = vmatprep.mubr.msk.f32.mxu0 %vm282_vm3, %v265_v38  ;;  %v1268_v38 = vld [vmem:[%s3418_s2 + $0x80] sm:$0xff] }
  0x53   : > { %2241 = vmatmul.mubr.msk.f32.gmra.mrb[32].mxu0 %vm282_vm3, %v266_v39  ;;  %v1269_v39 = vld [vmem:[%s3418_s2 + $0x88] sm:$0xff] }
  0x54   : > { %2243 = vmatprep.mubr.msk.f32.mxu0 %vm282_vm3, %v267_v40  ;;  %v2323_v54 = vpack.c.bf16 %v1269_v39, %v1268_v38 }
  0x57   : > { %2244 = vmatmul.mubr.msk.f32.gmra.mrb[34].mxu0 %vm282_vm3, %v268_v41 }
  0x58   : > { %2246 = vmatprep.mubr.msk.f32.mxu0 %vm282_vm3, %v269_v42  ;;  %v2320_v42 = vpack.c.bf16 %v1267_v34, %v1266_v33 }
  0x5a   : > { %2321 = vmatpush1.bf16.msra.mxu1 %v2320_v42 }
  0x5b   : > { %2247 = vmatmul.mubr.msk.f32.gmra.mrb[36].mxu0 %vm282_vm3, %v270_v43  ;;  %2322 = vmatprep.subr.bf16.mxu1 %v2510_v50 }
  0x5c   : > { %2249 = vmatprep.mubr.msk.f32.mxu0 %vm282_vm3, %v271_v44 }
  0x5e   : > { %2324 = vmatpush1.bf16.msra.mxu1 %v2323_v54 }
  0x5f   : > { %2250 = vmatmul.mubr.msk.f32.gmra.mrb[38].mxu0 %vm282_vm3, %v272_v45  ;;  %2325 = vmatprep.subr.bf16.mxu1 %v2510_v50 }
  0xe6   : > { %v2194_v61 = vpop.f32.mrb[0].mxu0 }
  0xe7   : > { %v2687_v63 = vadd.f32 %v2194_v61, %v2684_v60  ;;  %v473_v0 = vpop.f32.mrb[1].mxu0 }
  0xe8   : > { %v2697_v3 = vadd.f32 %v2684_v60, %v473_v0 }
  0xe9   : > { %v713_v4 = vmin.f32 %v2687_v63, 0.0  ;;  %vm673_vm5 = vcmp.gt.f32.partialorder %v2687_v63, 0.0 }
  0xea   : > { %v712_v5 = vmin.f32 %v2697_v3, 0.0  ;;  %v2197_v6 = vpop.f32.mrb[2].mxu0  ;;  %vm672_vm6 = vcmp.gt.f32.partialorder %v2697_v3, 0.0 }
  0xeb   : > { %v754_v8 = vmul.f32 1.442695, %v713_v4  ;;  %v2702_v9 = vadd.f32 %v2197_v6, %v2684_v60  ;;  %v483_v10 = vpop.f32.mrb[3].mxu0 }
  0xec   : > { %v752_v13 = vmul.f32 1.442695, %v712_v5  ;;  %v2712_v14 = vadd.f32 %v2684_v60, %v483_v10  ;;  %v2326_v10 = vpack.c.bf16 %v1271_v58, %v1270_v57 }
  0xed   : > { %2371 = vpow2.f32 %v754_v8  ;;  %v715_v15 = vmin.f32 %v2702_v9, 0.0  ;;  %vm675_vm7 = vcmp.gt.f32.partialorder %v2702_v9, 0.0 }
  0xee   : > { %2373 = vpow2.f32 %v752_v13  ;;  %v714_v16 = vmin.f32 %v2712_v14, 0.0  ;;  %v2200_v17 = vpop.f32.mrb[4].mxu0  ;;  %vm674_vm8 = vcmp.gt.f32.partialorder %v2712_v14, 0.0  ;;  %2327 = vmatpush1.bf16.msra.mxu1 %v2326_v10 }
  0xef   : > { %v758_v19 = vmul.f32 1.442695, %v715_v15  ;;  %v2717_v20 = vadd.f32 %v2200_v17, %v2684_v60  ;;  %v493_v21 = vpop.f32.mrb[5].mxu0  ;;  %v2791_v15 = vld [vmem:[%s3418_s2 + $0xb0] sm:$0xff]  ;;  %2328 = vmatprep.subr.bf16.mxu1 %v2510_v50 }
  0xf0   : > { %v756_v24 = vmul.f32 1.442695, %v714_v16  ;;  %v2727_v25 = vadd.f32 %v2684_v60, %v493_v21  ;;  %v2796_v16 = vld [vmem:[%s3418_s2 + $0xb8] sm:$0xff] }
  0xf1   : > { %2375 = vpow2.f32 %v758_v19  ;;  %v717_v26 = vmin.f32 %v2717_v20, 0.0  ;;  %vm677_vm9 = vcmp.gt.f32.partialorder %v2717_v20, 0.0 }
  0xf2   : > { %2377 = vpow2.f32 %v756_v24  ;;  %v716_v27 = vmin.f32 %v2727_v25, 0.0  ;;  %v2203_v28 = vpop.f32.mrb[6].mxu0  ;;  %vm676_vm10 = vcmp.gt.f32.partialorder %v2727_v25, 0.0 }
  0xf3   : > { %v762_v30 = vmul.f32 1.442695, %v717_v26  ;;  %v2732_v31 = vadd.f32 %v2203_v28, %v2684_v60  ;;  %v503_v32 = vpop.f32.mrb[7].mxu0 }
  0xf4   : > { %v760_v35 = vmul.f32 1.442695, %v716_v27  ;;  %v2742_v36 = vadd.f32 %v2684_v60, %v503_v32  ;;  %v2332_v32 = vpack.c.bf16 %v2796_v16, %v2791_v15 }
  0xf5   : > { %2379 = vpow2.f32 %v762_v30  ;;  %v719_v37 = vmin.f32 %v2732_v31, 0.0  ;;  %vm679_vm11 = vcmp.gt.f32.partialorder %v2732_v31, 0.0 }
  0xf6   : > { %2381 = vpow2.f32 %v760_v35  ;;  %v718_v40 = vmin.f32 %v2742_v36, 0.0  ;;  %v2206_v41 = vpop.f32.mrb[8].mxu0  ;;  %vm678_vm12 = vcmp.gt.f32.partialorder %v2742_v36, 0.0 }
  0xf7   : > { %v2372_v43 = vpop.eup %2371  ;;  %v766_v44 = vmul.f32 1.442695, %v719_v37  ;;  %v2753_v45 = vadd.f32 %v2206_v41, %v2684_v60  ;;  %v513_v48 = vpop.f32.mrb[9].mxu0 }
  0xf8   : > { %v2374_v49 = vpop.eup %2373  ;;  %v2004_v51 = vadd.f32 -1.0, %v2372_v43  ;;  %v764_v52 = vmul.f32 1.442695, %v718_v40  ;;  %v2757_v53 = vadd.f32 %v2684_v60, %v513_v48 }
  0xf9   : > { %v2003_v55 = vadd.f32 -1.0, %v2374_v49  ;;  %2383 = vpow2.f32 %v766_v44  ;;  %v721_v56 = vmin.f32 %v2753_v45, 0.0  ;;  %vm681_vm13 = vcmp.gt.f32.partialorder %v2753_v45, 0.0 }
  0xfa   : > { %v873_v59 = vsel %vm673_vm5, %v2687_v63, %v2004_v51  ;;  %2385 = vpow2.f32 %v764_v52  ;;  %v720_v61 = vmin.f32 %v2757_v53, 0.0  ;;  %v2209_v62 = vpop.f32.mrb[10].mxu0  ;;  %vm680_vm14 = vcmp.gt.f32.partialorder %v2757_v53, 0.0 }
  0xfb   : > { %v2376_v0 = vpop.eup %2375  ;;  %914 = vst.msk [vmem:[#allocation2 + $0x8] sm:$0xff] %vm912_vm4, %v873_v59  ;;  %v872_v1 = vsel %vm672_vm6, %v2697_v3, %v2003_v55  ;;  %v770_v2 = vmul.f32 1.442695, %v721_v56  ;;  %v2773_v4 = vadd.f32 %v2209_v62, %v2684_v60  ;;  %v523_v5 = vpop.f32.mrb[11].mxu0  ;;  %v1272_v3 = vld [vmem:[%s3418_s2 + $0xa0] sm:$0xff]  ;;  %vm1199_vm5 = vcmask 1045504  }
  0xfc   : > { %v2378_v63 = vpop.eup %2377  ;;  %913 = vst.msk [vmem:[#allocation2] sm:$0xff] %vm912_vm4, %v872_v1  ;;  %v2006_v6 = vadd.f32 -1.0, %v2376_v0  ;;  %v768_v7 = vmul.f32 1.442695, %v720_v61  ;;  %v2778_v8 = vadd.f32 %v2684_v60, %v523_v5  ;;  %vm1113_vm6 = vcmask 1046528  }
  0xfd   : > { %v2005_v12 = vadd.f32 -1.0, %v2378_v63  ;;  %2387 = vpow2.f32 %v770_v2  ;;  %v723_v13 = vmin.f32 %v2773_v4, 0.0  ;;  %vm683_vm15 = vcmp.gt.f32.partialorder %v2773_v4, 0.0 }
  0xfe   : > { %v875_v17 = vsel %vm675_vm7, %v2702_v9, %v2006_v6  ;;  %2389 = vpow2.f32 %v768_v7  ;;  %v722_v18 = vmin.f32 %v2778_v8, 0.0  ;;  %v2212_v19 = vpop.f32.mrb[12].mxu0  ;;  %v2329_v9 = vpack.c.bf16 %v1273_v11, %v1272_v3 }
  0xff   : > { %v2380_v21 = vpop.eup %2379  ;;  %916 = vst.msk [vmem:[#allocation2 + $0x18] sm:$0xff] %vm912_vm4, %v875_v17  ;;  %v874_v22 = vsel %vm674_vm8, %v2712_v14, %v2005_v12  ;;  %v774_v23 = vmul.f32 1.442695, %v723_v13  ;;  %v2804_v24 = vadd.f32 %v2212_v19, %v2684_v60  ;;  %v533_v26 = vpop.f32.mrb[13].mxu0  ;;  %vm682_vm0 = vcmp.gt.f32.partialorder %v2778_v8, 0.0 }
 0x100   : > { %v2382_v27 = vpop.eup %2381  ;;  %915 = vst.msk [vmem:[#allocation2 + $0x10] sm:$0xff] %vm912_vm4, %v874_v22  ;;  %v2008_v28 = vadd.f32 -1.0, %v2380_v21  ;;  %v772_v29 = vmul.f32 1.442695, %v722_v18  ;;  %v2809_v30 = vadd.f32 %v2684_v60, %v533_v26  ;;  %2330 = vmatpush1.bf16.msra.mxu1 %v2329_v9 }
 0x101   : > { %v2007_v14 = vadd.f32 -1.0, %v2382_v27  ;;  %2391 = vpow2.f32 %v774_v23  ;;  %v725_v33 = vmin.f32 %v2804_v24, 0.0  ;;  %2331 = vmatprep.subr.bf16.mxu1 %v2510_v50  ;;  %vm685_vm1 = vcmp.gt.f32.partialorder %v2804_v24, 0.0 }
 0x102   : > { %v877_v34 = vsel %vm677_vm9, %v2717_v20, %v2008_v28  ;;  %2393 = vpow2.f32 %v772_v29  ;;  %v724_v35 = vmin.f32 %v2809_v30, 0.0  ;;  %v2215_v37 = vpop.f32.mrb[14].mxu0  ;;  %vm684_vm2 = vcmp.gt.f32.partialorder %v2809_v30, 0.0 }
 0x103   : > { %v2384_v38 = vpop.eup %2383  ;;  %918 = vst.msk [vmem:[#allocation2 + $0x28] sm:$0xff] %vm912_vm4, %v877_v34  ;;  %v876_v39 = vsel %vm676_vm10, %v2727_v25, %v2007_v14  ;;  %v778_v40 = vmul.f32 1.442695, %v725_v33  ;;  %v2822_v41 = vadd.f32 %v2215_v37, %v2684_v60  ;;  %v543_v42 = vpop.f32.mrb[15].mxu0  ;;  %v953_v2 = vld [vmem:[#allocation2] ss:$2 sm:$0xff] }
 0x104   : > { %v2386_v20 = vpop.eup %2385  ;;  %917 = vst.msk [vmem:[#allocation2 + $0x20] sm:$0xff] %vm912_vm4, %v876_v39  ;;  %v2010_v43 = vadd.f32 -1.0, %v2384_v38  ;;  %v776_v44 = vmul.f32 1.442695, %v724_v35  ;;  %v2828_v48 = vadd.f32 %v2684_v60, %v543_v42  ;;  %v985_v5 = vld [vmem:[#allocation2 + $0x1] ss:$2 sm:$0xff]  ;;  %2333 = vmatpush1.bf16.msra.mxu1 %v2332_v32 }
 0x105   : > { %v2009_v25 = vadd.f32 -1.0, %v2386_v20  ;;  %2395 = vpow2.f32 %v778_v40  ;;  %v727_v49 = vmin.f32 %v2822_v41, 0.0  ;;  %v1016_v21 = vadd.f32 %v985_v5, %v953_v2 }
 0x106   : > { %v879_v51 = vsel %vm679_vm11, %v2732_v31, %v2010_v43  ;;  %2397 = vpow2.f32 %v776_v44  ;;  %v726_v52 = vmin.f32 %v2828_v48, 0.0  ;;  %v2218_v54 = vpop.f32.mrb[16].mxu0  ;;  %vm687_vm3 = vcmp.gt.f32.partialorder %v2822_v41, 0.0 }
 0x107   : > { %v2388_v55 = vpop.eup %2387  ;;  %920 = vst.msk [vmem:[#allocation2 + $0x38] sm:$0xff] %vm912_vm4, %v879_v51  ;;  %v878_v56 = vsel %vm678_vm12, %v2742_v36, %v2009_v25  ;;  %v782_v57 = vmul.f32 1.442695, %v727_v49  ;;  %v2839_v58 = vadd.f32 %v2218_v54, %v2684_v60  ;;  %v553_v59 = vpop.f32.mrb[17].mxu0  ;;  %v955_v7 = vld [vmem:[#allocation2 + $0x10] ss:$2 sm:$0xff] }
 0x108   : > { %v2390_v31 = vpop.eup %2389  ;;  %919 = vst.msk [vmem:[#allocation2 + $0x30] sm:$0xff] %vm912_vm4, %v878_v56  ;;  %v2012_v61 = vadd.f32 -1.0, %v2388_v55  ;;  %v780_v62 = vmul.f32 1.442695, %v726_v52  ;;  %v2845_v0 = vadd.f32 %v2684_v60, %v553_v59  ;;  %v987_v10 = vld [vmem:[#allocation2 + $0x11] ss:$2 sm:$0xff] }
 0x109   : > { %v2011_v36 = vadd.f32 -1.0, %v2390_v31  ;;  %2399 = vpow2.f32 %v782_v57  ;;  %v729_v1 = vmin.f32 %v2839_v58, 0.0  ;;  %v1033_v15 = vld [vmem:[#allocation2 + $0x2] ss:$2 sm:$0xff]  ;;  %v1017_v26 = vadd.f32 %v987_v10, %v955_v7 }
 0x10a   : > { %v881_v50 = vsel %vm681_vm13, %v2753_v45, %v2012_v61  ;;  %2401 = vpow2.f32 %v780_v62  ;;  %v728_v63 = vmin.f32 %v2845_v0, 0.0  ;;  %v2221_v6 = vpop.f32.mrb[18].mxu0  ;;  %v1064_v29 = vadd.f32 %v1033_v15, %v1016_v21 }
 0x10b   : > { %v2392_v3 = vpop.eup %2391  ;;  %922 = vst.msk [vmem:[#allocation2 + $0x48] sm:$0xff] %vm912_vm4, %v881_v50  ;;  %v880_v11 = vsel %vm680_vm14, %v2757_v53, %v2011_v36  ;;  %v786_v12 = vmul.f32 1.442695, %v729_v1  ;;  %v2859_v13 = vadd.f32 %v2221_v6, %v2684_v60  ;;  %v563_v45 = vpop.f32.mrb[19].mxu0  ;;  %v1035_v22 = vld [vmem:[#allocation2 + $0x12] ss:$2 sm:$0xff] }
 0x10c   : > { %v2394_v16 = vpop.eup %2393  ;;  %921 = vst.msk [vmem:[#allocation2 + $0x40] sm:$0xff] %vm912_vm4, %v880_v11  ;;  %v2014_v17 = vadd.f32 -1.0, %v2392_v3  ;;  %v784_v18 = vmul.f32 1.442695, %v728_v63  ;;  %v2863_v19 = vadd.f32 %v2684_v60, %v563_v45  ;;  %v1065_v37 = vadd.f32 %v1035_v22, %v1017_v26 }
 0x10d   : > { %v2013_v23 = vadd.f32 -1.0, %v2394_v16  ;;  %2403 = vpow2.f32 %v786_v12  ;;  %v731_v53 = vmin.f32 %v2859_v13, 0.0  ;;  %vm686_vm7 = vcmp.gt.f32.partialorder %v2828_v48, 0.0 }
 0x10e   : > { %v883_v9 = vsel %vm683_vm15, %v2773_v4, %v2014_v17  ;;  %2405 = vpow2.f32 %v784_v18  ;;  %v730_v27 = vmin.f32 %v2863_v19, 0.0  ;;  %v2224_v28 = vpop.f32.mrb[20].mxu0  ;;  %vm689_vm8 = vcmp.gt.f32.partialorder %v2839_v58, 0.0 }
 0x10f   : > { %v2396_v32 = vpop.eup %2395  ;;  %924 = vst.msk [vmem:[#allocation2 + $0x58] sm:$0xff] %vm912_vm4, %v883_v9  ;;  %v882_v14 = vsel %vm682_vm0, %v2778_v8, %v2013_v23  ;;  %v790_v33 = vmul.f32 1.442695, %v731_v53  ;;  %v2876_v34 = vadd.f32 %v2224_v28, %v2684_v60  ;;  %v573_v35 = vpop.f32.mrb[21].mxu0  ;;  %vm688_vm9 = vcmp.gt.f32.partialorder %v2845_v0, 0.0 }
 0x110   : > { %v2398_v4 = vpop.eup %2397  ;;  %923 = vst.msk [vmem:[#allocation2 + $0x50] sm:$0xff] %vm912_vm4, %v882_v14  ;;  %v2016_v38 = vadd.f32 -1.0, %v2396_v32  ;;  %v788_v39 = vmul.f32 1.442695, %v730_v27  ;;  %v2881_v40 = vadd.f32 %v2684_v60, %v573_v35  ;;  %v2889_v25 = vmul.f32 0.33333334, %v1064_v29 }
 0x111   : > { %v2015_v42 = vadd.f32 -1.0, %v2398_v4  ;;  %2407 = vpow2.f32 %v790_v33  ;;  %v733_v8 = vmin.f32 %v2876_v34, 0.0  ;;  %v2898_v56 = vmul.f32 0.33333334, %v1065_v37  ;;  %v957_v22 = vld [vmem:[#allocation2 + $0x28] ss:$2 sm:$0xff] }
 0x112   : > { %v885_v20 = vsel %vm685_vm1, %v2804_v24, %v2016_v38  ;;  %2409 = vpow2.f32 %v788_v39  ;;  %v732_v43 = vmin.f32 %v2881_v40, 0.0  ;;  %v2227_v44 = vpop.f32.mrb[22].mxu0  ;;  %vm691_vm10 = vcmp.gt.f32.partialorder %v2859_v13, 0.0  ;;  %v989_v23 = vld [vmem:[#allocation2 + $0x29] ss:$2 sm:$0xff] }
 0x113   : > { %v2400_v49 = vpop.eup %2399  ;;  %926 = vst.msk [vmem:[#allocation2 + $0x68] sm:$0xff] %vm912_vm4, %v885_v20  ;;  %v884_v51 = vsel %vm684_vm2, %v2809_v30, %v2015_v42  ;;  %v794_v52 = vmul.f32 1.442695, %v733_v8  ;;  %v2896_v54 = vadd.f32 %v2227_v44, %v2684_v60  ;;  %v583_v55 = vpop.f32.mrb[23].mxu0  ;;  %v1200_v1 = vrot.slane %v2889_v25, 2 }
 0x114   : > { %v2402_v24 = vpop.eup %2401  ;;  %925 = vst.msk [vmem:[#allocation2 + $0x60] sm:$0xff] %vm912_vm4, %v884_v51  ;;  %v2018_v57 = vadd.f32 -1.0, %v2400_v49  ;;  %v792_v59 = vmul.f32 1.442695, %v732_v43  ;;  %v2903_v31 = vadd.f32 %v2684_v60, %v583_v55  ;;  %v1201_v6 = vrot.slane %v2898_v56, 2 }
 0x115   : > { %v2017_v61 = vadd.f32 -1.0, %v2402_v24  ;;  %2411 = vpow2.f32 %v794_v52  ;;  %v735_v30 = vmin.f32 %v2896_v54, 0.0  ;;  %v1114_v7 = vrot.slane %v2889_v25, 1  ;;  %v959_v14 = vld [vmem:[#allocation2 + $0x38] ss:$2 sm:$0xff] }
 0x116   : > { %v887_v62 = vsel %vm687_vm3, %v2822_v41, %v2018_v57  ;;  %2413 = vpow2.f32 %v792_v59  ;;  %v734_v36 = vmin.f32 %v2903_v31, 0.0  ;;  %v2230_v2 = vpop.f32.mrb[24].mxu0  ;;  %v1115_v12 = vrot.slane %v2898_v56, 1  ;;  %v991_v33 = vld [vmem:[#allocation2 + $0x39] ss:$2 sm:$0xff] }
 0x117   : > { %v2404_v5 = vpop.eup %2403  ;;  %928 = vst.msk [vmem:[#allocation2 + $0x78] sm:$0xff] %vm912_vm4, %v887_v62  ;;  %v886_v50 = vsel %vm686_vm7, %v2828_v48, %v2017_v61  ;;  %v798_v63 = vmul.f32 1.442695, %v735_v30  ;;  %v593_v10 = vpop.f32.mrb[25].mxu0  ;;  %v2921_v45 = vadd.f32 %v2230_v2, %v2684_v60  ;;  %v1202_v48 = vsel %vm1199_vm5, %v1200_v1, %v1201_v6  ;;  %v1037_v51 = vld [vmem:[#allocation2 + $0x2a] ss:$2 sm:$0xff] }
 0x118   : > { %v2406_v41 = vpop.eup %2405  ;;  %927 = vst.msk [vmem:[#allocation2 + $0x70] sm:$0xff] %vm912_vm4, %v886_v50  ;;  %v2020_v3 = vadd.f32 -1.0, %v2404_v5  ;;  %v796_v11 = vmul.f32 1.442695, %v734_v36  ;;  %v2927_v16 = vadd.f32 %v2684_v60, %v593_v10  ;;  %vm690_vm11 = vcmp.gt.f32.partialorder %v2863_v19, 0.0  ;;  %2044 = vmatprep.mubr.msk.f32.mxu1 %vm912_vm4, %v1202_v48 }
 0x119   : > { %v2019_v15 = vadd.f32 -1.0, %v2406_v41  ;;  %2415 = vpow2.f32 %v798_v63  ;;  %v1116_v18 = vsel %vm1113_vm6, %v1114_v7, %v1115_v12  ;;  %vm693_vm12 = vcmp.gt.f32.partialorder %v2876_v34, 0.0  ;;  %v1039_v59 = vld [vmem:[#allocation2 + $0x3a] ss:$2 sm:$0xff] }
 0x11a   : > { %v889_v17 = vsel %vm689_vm8, %v2839_v58, %v2020_v3  ;;  %2417 = vpow2.f32 %v796_v11  ;;  %v2233_v21 = vpop.f32.mrb[26].mxu0  ;;  %1148 = vrot.lane.b32.xlu0 %v1116_v18, %s2509_s8  ;;  %v737_v58 = vmin.f32 %v2921_v45, 0.0  ;;  %v736_v9 = vmin.f32 %v2927_v16, 0.0 }
 0x11b   : > { %v2408_v53 = vpop.eup %2407  ;;  %930 = vst.msk [vmem:[#allocation2 + $0x88] sm:$0xff] %vm912_vm4, %v889_v17  ;;  %v888_v26 = vsel %vm688_vm9, %v2845_v0, %v2019_v15  ;;  %v603_v27 = vpop.f32.mrb[27].mxu0  ;;  %vm692_vm13 = vcmp.gt.f32.partialorder %v2881_v40, 0.0  ;;  %v2946_v32 = vadd.f32 %v2233_v21, %v2684_v60  ;;  %v1018_v38 = vadd.f32 %v989_v23, %v957_v22  ;;  %v961_v15 = vld [vmem:[#allocation2 + $0x50] ss:$2 sm:$0xff] }
 0x11c   : > { %v2410_v28 = vpop.eup %2409  ;;  %929 = vst.msk [vmem:[#allocation2 + $0x80] sm:$0xff] %vm912_vm4, %v888_v26  ;;  %v2022_v29 = vadd.f32 -1.0, %v2408_v53  ;;  %v2949_v0 = vadd.f32 %v2684_v60, %v603_v27  ;;  %v802_v37 = vmul.f32 1.442695, %v737_v58  ;;  %v800_v4 = vmul.f32 1.442695, %v736_v9 }
 0x11d   : > { %v2021_v35 = vadd.f32 -1.0, %v2410_v28  ;;  %vm695_vm14 = vcmp.gt.f32.partialorder %v2896_v54, 0.0  ;;  %v1118_v42 = vsel %vm1113_vm6, %v1115_v12, %v2650_v47  ;;  %v739_v8 = vmin.f32 %v2946_v32, 0.0  ;;  %v993_v21 = vld [vmem:[#allocation2 + $0x51] ss:$2 sm:$0xff] }
 0x11e   : > { %v891_v39 = vsel %vm691_vm10, %v2859_v13, %v2022_v29  ;;  %v2236_v20 = vpop.f32.mrb[28].mxu0  ;;  %2419 = vpow2.f32 %v802_v37  ;;  %1150 = vrot.lane.b32.xlu0 %v1118_v42, %s2509_s8  ;;  %v738_v13 = vmin.f32 %v2949_v0, 0.0  ;;  %v1019_v49 = vadd.f32 %v991_v33, %v959_v14  ;;  %v1041_v29 = vld [vmem:[#allocation2 + $0x52] ss:$2 sm:$0xff] }
 0x11f   : > { %v2412_v43 = vpop.eup %2411  ;;  %932 = vst.msk [vmem:[#allocation2 + $0x98] sm:$0xff] %vm912_vm4, %v891_v39  ;;  %v890_v44 = vsel %vm690_vm11, %v2863_v19, %v2021_v35  ;;  %v613_v52 = vpop.f32.mrb[29].mxu0  ;;  %2421 = vpow2.f32 %v800_v4  ;;  %v806_v57 = vmul.f32 1.442695, %v739_v8  ;;  %v1066_v61 = vadd.f32 %v1037_v51, %v1018_v38  ;;  %v963_v38 = vld [vmem:[#allocation2 + $0x60] ss:$2 sm:$0xff] }
 0x120   : > { %v2414_v55 = vpop.eup %2413  ;;  %931 = vst.msk [vmem:[#allocation2 + $0x90] sm:$0xff] %vm912_vm4, %v890_v44  ;;  %v2024_v24 = vadd.f32 -1.0, %v2412_v43  ;;  %v804_v62 = vmul.f32 1.442695, %v738_v13  ;;  %v1067_v36 = vadd.f32 %v1039_v59, %v1019_v49  ;;  %v2966_v19 = vadd.f32 %v2236_v20, %v2684_v60  ;;  %v995_v39 = vld [vmem:[#allocation2 + $0x61] ss:$2 sm:$0xff] }
 0x121   : > { %v2023_v30 = vadd.f32 -1.0, %v2414_v55  ;;  %2423 = vpow2.f32 %v806_v57  ;;  %v2971_v2 = vmul.f32 0.33333334, %v1066_v61  ;;  %v2974_v5 = vadd.f32 %v2684_v60, %v613_v52  ;;  %v1043_v43 = vld [vmem:[#allocation2 + $0x62] ss:$2 sm:$0xff] }
 0x122   : > { %v893_v1 = vsel %vm693_vm12, %v2876_v34, %v2024_v24  ;;  %v2239_v50 = vpop.f32.mrb[30].mxu0  ;;  %vm694_vm15 = vcmp.gt.f32.partialorder %v2903_v31, 0.0  ;;  %2425 = vpow2.f32 %v804_v62  ;;  %v2981_v10 = vmul.f32 0.33333334, %v1067_v36 }
 0x123   : > { %v2416_v63 = vpop.eup %2415  ;;  %934 = vst.msk [vmem:[#allocation2 + $0xa8] sm:$0xff] %vm912_vm4, %v893_v1  ;;  %v892_v7 = vsel %vm692_vm13, %v2881_v40, %v2023_v30  ;;  %v623_v34 = vpop.f32.mrb[31].mxu0  ;;  %vm697_vm0 = vcmp.gt.f32.partialorder %v2921_v45, 0.0  ;;  %v1120_v11 = vrot.slane %v2971_v2, 1  ;;  %v741_v12 = vmin.f32 %v2966_v19, 0.0 }
 0x124   : > { %v2418_v41 = vpop.eup %2417  ;;  %933 = vst.msk [vmem:[#allocation2 + $0xa0] sm:$0xff] %vm912_vm4, %v892_v7  ;;  %v2026_v3 = vadd.f32 -1.0, %v2416_v63  ;;  %v1121_v40 = vrot.slane %v2981_v10, 1  ;;  %v740_v17 = vmin.f32 %v2974_v5, 0.0  ;;  %v2990_v18 = vadd.f32 %v2239_v50, %v2684_v60 }
 0x125   : > { %v2025_v48 = vadd.f32 -1.0, %v2418_v41  ;;  %vm696_vm1 = vcmp.gt.f32.partialorder %v2927_v16, 0.0  ;;  %v810_v23 = vmul.f32 1.442695, %v741_v12  ;;  %v2997_v53 = vadd.f32 %v2684_v60, %v623_v34  ;;  %v965_v12 = vld [vmem:[#allocation2 + $0x78] ss:$2 sm:$0xff] }
 0x126   : > { %v895_v22 = vsel %vm695_vm14, %v2896_v54, %v2026_v3  ;;  %v2242_v26 = vpop.f32.mrb[32].mxu0  ;;  %v1122_v9 = vsel %vm1113_vm6, %v1120_v11, %v1121_v40  ;;  %v1123_v27 = vsel %vm1113_vm6, %v1121_v40, %v2650_v47  ;;  %v808_v28 = vmul.f32 1.442695, %v740_v17 }
 0x127   : > { %936 = vst.msk [vmem:[#allocation2 + $0xb8] sm:$0xff] %vm912_vm4, %v895_v22  ;;  %v894_v58 = vsel %vm694_vm15, %v2903_v31, %v2025_v48  ;;  %v633_v54 = vpop.f32.mrb[33].mxu0  ;;  %vm699_vm2 = vcmp.gt.f32.partialorder %v2946_v32, 0.0  ;;  %1154 = vrot.lane.b32.xlu1 %v1122_v9, %s2509_s8  ;;  %1156 = vrot.lane.b32.xlu0 %v1123_v27, %s2509_s8  ;;  %2427 = vpow2.f32 %v810_v23  ;;  %v743_v14 = vmin.f32 %v2990_v18, 0.0  ;;  %v999_v17 = vld [vmem:[#allocation2 + $0x89] ss:$2 sm:$0xff] }
 0x128   : > { %935 = vst.msk [vmem:[#allocation2 + $0xb0] sm:$0xff] %vm912_vm4, %v894_v58  ;;  %v1020_v31 = vadd.f32 %v993_v21, %v961_v15  ;;  %v2420_v33 = vpop.eup %2419  ;;  %2429 = vpow2.f32 %v808_v28  ;;  %v742_v35 = vmin.f32 %v2997_v53, 0.0  ;;  %v3013_v37 = vadd.f32 %v2242_v26, %v2684_v60  ;;  %v997_v15 = vld [vmem:[#allocation2 + $0x79] ss:$2 sm:$0xff] }
 0x129   : > { %v3016_v4 = vadd.f32 %v2684_v60, %v633_v54  ;;  %v2422_v42 = vpop.eup %2421  ;;  %v2028_v8 = vadd.f32 -1.0, %v2420_v33  ;;  %v814_v20 = vmul.f32 1.442695, %v743_v14  ;;  %vm698_vm3 = vcmp.gt.f32.partialorder %v2949_v0, 0.0 }
 0x12a   : > { %v1068_v44 = vadd.f32 %v1041_v29, %v1020_v31  ;;  %v2245_v13 = vpop.f32.mrb[34].mxu0  ;;  %v2027_v49 = vadd.f32 -1.0, %v2422_v42  ;;  %v812_v51 = vmul.f32 1.442695, %v742_v35  ;;  %v745_v52 = vmin.f32 %v3013_v37, 0.0 }
 0x12b   : > { %v643_v55 = vpop.f32.mrb[35].mxu0  ;;  %v2424_v24 = vpop.eup %2423  ;;  %v897_v57 = vsel %vm697_vm0, %v2921_v45, %v2028_v8  ;;  %vm701_vm7 = vcmp.gt.f32.partialorder %v2966_v19, 0.0  ;;  %2431 = vpow2.f32 %v814_v20  ;;  %v744_v59 = vmin.f32 %v3016_v4, 0.0 }
 0x12c   : > { %v1021_v61 = vadd.f32 %v995_v39, %v963_v38  ;;  %v2426_v30 = vpop.eup %2425  ;;  %938 = vst.msk [vmem:[#allocation2 + $0xc8] sm:$0xff] %vm912_vm4, %v897_v57  ;;  %v896_v62 = vsel %vm696_vm1, %v2927_v16, %v2027_v49  ;;  %v2030_v36 = vadd.f32 -1.0, %v2424_v24  ;;  %vm700_vm8 = vcmp.gt.f32.partialorder %v2974_v5, 0.0  ;;  %v1047_v49 = vld [vmem:[#allocation2 + $0x8a] ss:$2 sm:$0xff] }
 0x12d   : > { %2433 = vpow2.f32 %v812_v51  ;;  %v818_v1 = vmul.f32 1.442695, %v745_v52  ;;  %937 = vst.msk [vmem:[#allocation2 + $0xc0] sm:$0xff] %vm912_vm4, %v896_v62  ;;  %v2029_v45 = vadd.f32 -1.0, %v2426_v30  ;;  %v816_v50 = vmul.f32 1.442695, %v744_v59 }
 0x12e   : > { %v1069_v63 = vadd.f32 %v1043_v43, %v1021_v61  ;;  %v3031_v7 = vmul.f32 0.33333334, %v1068_v44  ;;  %v2248_v34 = vpop.f32.mrb[36].mxu0  ;;  %v899_v41 = vsel %vm699_vm2, %v2946_v32, %v2030_v36  ;;  %v3037_v16 = vadd.f32 %v2245_v13, %v2684_v60  ;;  %v967_v32 = vld [vmem:[#allocation2 + $0x88] ss:$2 sm:$0xff] }
 0x12f   : > { %2435 = vpow2.f32 %v818_v1  ;;  %v3040_v3 = vadd.f32 %v2684_v60, %v643_v55  ;;  %v653_v11 = vpop.f32.mrb[37].mxu0  ;;  %940 = vst.msk [vmem:[#allocation2 + $0xd8] sm:$0xff] %vm912_vm4, %v899_v41  ;;  %v898_v48 = vsel %vm698_vm3, %v2949_v0, %v2029_v45  ;;  %vm703_vm9 = vcmp.gt.f32.partialorder %v2990_v18, 0.0  ;;  %v1045_v43 = vld [vmem:[#allocation2 + $0x7a] ss:$2 sm:$0xff] }
 0x130   : > { %2437 = vpow2.f32 %v816_v50  ;;  %v3046_v40 = vmul.f32 0.33333334, %v1069_v63  ;;  %939 = vst.msk [vmem:[#allocation2 + $0xd0] sm:$0xff] %vm912_vm4, %v898_v48  ;;  %v1124_v21 = vrot.slane %v3031_v7, 1  ;;  %v747_v22 = vmin.f32 %v3037_v16, 0.0 }
 0x131   : > { %v746_v23 = vmin.f32 %v3040_v3, 0.0  ;;  %v2428_v26 = vpop.eup %2427  ;;  %v3055_v0 = vadd.f32 %v2248_v34, %v2684_v60  ;;  %v3058_v9 = vadd.f32 %v2684_v60, %v653_v11  ;;  %v1022_v27 = vadd.f32 %v997_v15, %v965_v12  ;;  %v969_v61 = vld [vmem:[#allocation2 + $0xa0] ss:$2 sm:$0xff]  ;;  %v971_v30 = vld [vmem:[#allocation2 + $0xb0] ss:$2 sm:$0xff] }
 0x132   : > { %v1125_v58 = vrot.slane %v3046_v40, 1  ;;  %v2251_v28 = vpop.f32.mrb[38].mxu0  ;;  %v2430_v54 = vpop.eup %2429  ;;  %v2032_v29 = vadd.f32 -1.0, %v2428_v26  ;;  %v822_v14 = vmul.f32 1.442695, %v747_v22  ;;  %v1023_v33 = vadd.f32 %v999_v17, %v967_v32 }
 0x133   : > { %v820_v31 = vmul.f32 1.442695, %v746_v23  ;;  %v663_v35 = vpop.f32.mrb[39].mxu0  ;;  %v2031_v38 = vadd.f32 -1.0, %v2430_v54  ;;  %vm702_vm10 = vcmp.gt.f32.partialorder %v2997_v53, 0.0  ;;  %vm705_vm11 = vcmp.gt.f32.partialorder %v3013_v37, 0.0 }
 0x134   : > { %v1126_v39 = vsel %vm1113_vm6, %v1124_v21, %v1125_v58  ;;  %v1127_v42 = vsel %vm1113_vm6, %v1125_v58, %v2650_v47  ;;  %v901_v8 = vsel %vm701_vm7, %v2966_v19, %v2032_v29  ;;  %2439 = vpow2.f32 %v822_v14  ;;  %v1001_v62 = vld [vmem:[#allocation2 + $0xa1] ss:$2 sm:$0xff]  ;;  %v1003_v41 = vld [vmem:[#allocation2 + $0xb1] ss:$2 sm:$0xff]  ;;  %v1049_v11 = vld [vmem:[#allocation2 + $0xa2] ss:$2 sm:$0xff] }
 0x135   : > { %1158 = vrot.lane.b32.xlu1 %v1126_v39, %s2509_s8  ;;  %1160 = vrot.lane.b32.xlu0 %v1127_v42, %s2509_s8  ;;  %v749_v20 = vmin.f32 %v3055_v0, 0.0  ;;  %v2432_v44 = vpop.eup %2431  ;;  %942 = vst.msk [vmem:[#allocation2 + $0xe8] sm:$0xff] %vm912_vm4, %v901_v8  ;;  %v900_v13 = vsel %vm700_vm8, %v2974_v5, %v2031_v38  ;;  %2441 = vpow2.f32 %v820_v31  ;;  %v748_v19 = vmin.f32 %v3058_v9, 0.0 }
 0x136   : > { %v1070_v51 = vadd.f32 %v1045_v43, %v1022_v27  ;;  %941 = vst.msk [vmem:[#allocation2 + $0xe0] sm:$0xff] %vm912_vm4, %v900_v13  ;;  %v2034_v55 = vadd.f32 -1.0, %v2432_v44  ;;  %v1071_v57 = vadd.f32 %v1047_v49, %v1023_v33  ;;  %v3078_v59 = vadd.f32 %v2251_v28, %v2684_v60 }
 0x137   : > { %v2434_v52 = vpop.eup %2433  ;;  %v826_v24 = vmul.f32 1.442695, %v749_v20  ;;  %v824_v1 = vmul.f32 1.442695, %v748_v19  ;;  %v3083_v45 = vadd.f32 %v2684_v60, %v663_v35  ;;  %vm704_vm12 = vcmp.gt.f32.partialorder %v3016_v4, 0.0 }
 0x138   : > { %v2033_v36 = vadd.f32 -1.0, %v2434_v52  ;;  %v3080_v5 = vmul.f32 0.33333334, %v1070_v51  ;;  %v903_v63 = vsel %vm703_vm9, %v2990_v18, %v2034_v55  ;;  %v3088_v34 = vmul.f32 0.33333334, %v1071_v57 }
 0x139   : > { %v2436_v50 = vpop.eup %2435  ;;  %2443 = vpow2.f32 %v826_v24  ;;  %944 = vst.msk [vmem:[#allocation2 + $0xf8] sm:$0xff] %vm912_vm4, %v903_v63  ;;  %v1051_v60 = vld [vmem:[#allocation2 + $0xb2] ss:$2 sm:$0xff]  ;;  %v751_v22 = vmin.f32 %v3078_v59, 0.0  ;;  %v1005_v23 = vld [vmem:[#allocation2 + $0xc9] ss:$2 sm:$0xff]  ;;  %v1024_v58 = vadd.f32 %v1001_v62, %v969_v61  ;;  %v1025_v27 = vadd.f32 %v1003_v41, %v971_v30 }
 0x13a   : > { %v2438_v12 = vpop.eup %2437  ;;  %v902_v15 = vsel %vm702_vm10, %v2997_v53, %v2033_v36  ;;  %v2036_v48 = vadd.f32 -1.0, %v2436_v50  ;;  %2445 = vpow2.f32 %v824_v1  ;;  %v973_v32 = vld [vmem:[#allocation2 + $0xc8] ss:$2 sm:$0xff]  ;;  %v1128_v17 = vrot.slane %v3080_v5, 1 }
 0x13b   : > { %943 = vst.msk [vmem:[#allocation2 + $0xf0] sm:$0xff] %vm912_vm4, %v902_v15  ;;  %v2035_v18 = vadd.f32 -1.0, %v2438_v12  ;;  %v1129_v21 = vrot.slane %v3088_v34, 1  ;;  %v750_v26 = vmin.f32 %v3083_v45, 0.0  ;;  %v830_v14 = vmul.f32 1.442695, %v751_v22 }
 0x13c   : > { %v905_v53 = vsel %vm705_vm11, %v3013_v37, %v2036_v48  ;;  %v1072_v31 = vadd.f32 %v1049_v11, %v1024_v58  ;;  %v1073_v33 = vadd.f32 %v1051_v60, %v1025_v27  ;;  %v1026_v39 = vadd.f32 %v1005_v23, %v973_v32  ;;  %v1053_v8 = vld [vmem:[#allocation2 + $0xca] ss:$2 sm:$0xff] }
 0x13d   : > { %946 = vst.msk [vmem:[#allocation2 + $0x108] sm:$0xff] %vm912_vm4, %v905_v53  ;;  %v904_v28 = vsel %vm704_vm12, %v3016_v4, %v2035_v18  ;;  %v1130_v54 = vsel %vm1113_vm6, %v1128_v17, %v1129_v21  ;;  %v1131_v29 = vsel %vm1113_vm6, %v1129_v21, %v2650_v47  ;;  %v828_v37 = vmul.f32 1.442695, %v750_v26  ;;  %v975_v35 = vld [vmem:[#allocation2 + $0xd8] ss:$2 sm:$0xff] }
 0x13e   : > { %945 = vst.msk [vmem:[#allocation2 + $0x100] sm:$0xff] %vm912_vm4, %v904_v28  ;;  %1162 = vrot.lane.b32.xlu1 %v1130_v54, %s2509_s8  ;;  %1164 = vrot.lane.b32.xlu0 %v1131_v29, %s2509_s8  ;;  %v1007_v38 = vld [vmem:[#allocation2 + $0xd9] ss:$2 sm:$0xff]  ;;  %v2440_v42 = vpop.eup %2439  ;;  %2447 = vpow2.f32 %v830_v14  ;;  %v1055_v20 = vld [vmem:[#allocation2 + $0xda] ss:$2 sm:$0xff]  ;;  %vm707_vm13 = vcmp.gt.f32.partialorder %v3037_v16, 0.0  ;;  %v1074_v51 = vadd.f32 %v1053_v8, %v1026_v39 }
 0x13f   : > { %v1027_v4 = vadd.f32 %v1007_v38, %v975_v35  ;;  %v2442_v43 = vpop.eup %2441  ;;  %v2038_v44 = vadd.f32 -1.0, %v2440_v42  ;;  %2449 = vpow2.f32 %v828_v37  ;;  %v3111_v13 = vmul.f32 0.33333334, %v1072_v31 }
 0x140   : > { %v3113_v19 = vmul.f32 0.33333334, %v1073_v33  ;;  %v2037_v49 = vadd.f32 -1.0, %v2442_v43  ;;  %vm706_vm14 = vcmp.gt.f32.partialorder %v3040_v3, 0.0  ;;  %v3122_v36 = vmul.f32 0.33333334, %v1074_v51 }
 0x141   : > { %v1075_v52 = vadd.f32 %v1055_v20, %v1027_v4  ;;  %v907_v55 = vsel %vm707_vm13, %v3037_v16, %v2038_v44  ;;  %v1132_v24 = vrot.slane %v3111_v13, 1  ;;  %vm709_vm15 = vcmp.gt.f32.partialorder %v3055_v0, 0.0 }
 0x142   : > { %v1133_v57 = vrot.slane %v3113_v19, 1  ;;  %v977_v61 = vld [vmem:[#allocation2 + $0xf0] ss:$2 sm:$0xff]  ;;  %948 = vst.msk [vmem:[#allocation2 + $0x118] sm:$0xff] %vm912_vm4, %v907_v55  ;;  %v906_v62 = vsel %vm706_vm14, %v3040_v3, %v2037_v49  ;;  %v1009_v50 = vld [vmem:[#allocation2 + $0xf1] ss:$2 sm:$0xff] }
 0x143   : > { %v2444_v30 = vpop.eup %2443  ;;  %v3124_v1 = vmul.f32 0.33333334, %v1075_v52  ;;  %947 = vst.msk [vmem:[#allocation2 + $0x110] sm:$0xff] %vm912_vm4, %v906_v62  ;;  %v1136_v3 = vrot.slane %v3122_v36, 1  ;;  %vm708_vm0 = vcmp.gt.f32.partialorder %v3058_v9, 0.0  ;;  %v1028_v60 = vadd.f32 %v1009_v50, %v977_v61 }
 0x144   : > { %v2446_v63 = vpop.eup %2445  ;;  %v2040_v16 = vadd.f32 -1.0, %v2444_v30  ;;  %v1134_v41 = vsel %vm1113_vm6, %v1132_v24, %v1133_v57  ;;  %v1135_v11 = vsel %vm1113_vm6, %v1133_v57, %v2650_v47  ;;  %vm711_vm1 = vcmp.gt.f32.partialorder %v3078_v59, 0.0 }
 0x145   : > { %v2039_v12 = vadd.f32 -1.0, %v2446_v63  ;;  %1166 = vrot.lane.b32.xlu1 %v1134_v41, %s2509_s8  ;;  %1168 = vrot.lane.b32.xlu0 %v1135_v11, %s2509_s8  ;;  %v1137_v15 = vrot.slane %v3124_v1, 1  ;;  %v1057_v32 = vld [vmem:[#allocation2 + $0xf2] ss:$2 sm:$0xff]  ;;  %v1011_v23 = vld [vmem:[#allocation2 + $0x101] ss:$2 sm:$0xff]  ;;  %v3186_v11 = vpop.permute.xlu1 %1152 }
 0x146   : > { %v909_v48 = vsel %vm709_vm15, %v3055_v0, %v2040_v16  ;;  %v979_v22 = vld [vmem:[#allocation2 + $0x100] ss:$2 sm:$0xff]  ;;  %v1076_v53 = vadd.f32 %v1057_v32, %v1028_v60  ;;  %vm710_vm2 = vcmp.gt.f32.partialorder %v3083_v45, 0.0  ;;  %v3174_v62 = vrot.slane %v2508_v46, 2 }
 0x147   : > { %950 = vst.msk [vmem:[#allocation2 + $0x128] sm:$0xff] %vm912_vm4, %v909_v48  ;;  %v908_v18 = vsel %vm708_vm0, %v3058_v9, %v2039_v12  ;;  %v1138_v17 = vsel %vm1113_vm6, %v1136_v3, %v1137_v15  ;;  %v1139_v21 = vsel %vm1113_vm6, %v1137_v15, %v2650_v47  ;;  %v1029_v27 = vadd.f32 %v1011_v23, %v979_v22 }
 0x148   : > { %949 = vst.msk [vmem:[#allocation2 + $0x120] sm:$0xff] %vm912_vm4, %v908_v18  ;;  %v2448_v26 = vpop.eup %2447  ;;  %v3148_v14 = vmul.f32 0.33333334, %v1076_v53  ;;  %v1204_v16 = vsel %vm1199_vm5, %v1201_v6, %v3174_v62  ;;  %v1207_v46 = vrot.slane %v2981_v10, 2  ;;  %v1206_v6 = vrot.slane %v2971_v2, 2 }
 0x149   : > { %1170 = vrot.lane.b32.xlu1 %v1138_v17, %s2509_s8  ;;  %1172 = vrot.lane.b32.xlu0 %v1139_v21, %s2509_s8  ;;  %v2450_v0 = vpop.eup %2449  ;;  %v2042_v58 = vadd.f32 -1.0, %v2448_v26  ;;  %v1211_v32 = vrot.slane %v3046_v40, 2  ;;  %v1210_v18 = vrot.slane %v3031_v7, 2  ;;  %v1215_v53 = vrot.slane %v3088_v34, 2 }
 0x14a   : > { %v2041_v9 = vadd.f32 -1.0, %v2450_v0  ;;  %v1059_v28 = vld [vmem:[#allocation2 + $0x102] ss:$2 sm:$0xff]  ;;  %v1140_v38 = vrot.slane %v3148_v14, 1  ;;  %v1209_v48 = vsel %vm1199_vm5, %v1207_v46, %v3174_v62  ;;  %v1214_v26 = vrot.slane %v3080_v5, 2 }
 0x14b   : > { %v911_v54 = vsel %vm711_vm1, %v3078_v59, %v2042_v58  ;;  %v1077_v29 = vadd.f32 %v1059_v28, %v1029_v27  ;;  %v1213_v22 = vsel %vm1199_vm5, %v1211_v32, %v3174_v62  ;;  %v1217_v27 = vsel %vm1199_vm5, %v1215_v53, %v3174_v62 }
 0x14c   : > { %952 = vst.msk [vmem:[#allocation2 + $0x138] sm:$0xff] %vm912_vm4, %v911_v54  ;;  %v910_v37 = vsel %vm710_vm2, %v3083_v45, %v2041_v9  ;;  %v1219_v28 = vrot.slane %v3113_v19, 2  ;;  %v1218_v54 = vrot.slane %v3111_v13, 2 }
 0x14d   : > { %951 = vst.msk [vmem:[#allocation2 + $0x130] sm:$0xff] %vm912_vm4, %v910_v37  ;;  %v3153_v31 = vmul.f32 0.33333334, %v1077_v29 }
 0x14f   : > { %v981_v33 = vld [vmem:[#allocation2 + $0x118] ss:$2 sm:$0xff]  ;;  %v1013_v35 = vld [vmem:[#allocation2 + $0x119] ss:$2 sm:$0xff]  ;;  %v1141_v39 = vrot.slane %v3153_v31, 1 }
 0x150   : > { %v1030_v59 = vadd.f32 %v1013_v35, %v981_v33  ;;  %v1061_v45 = vld [vmem:[#allocation2 + $0x11a] ss:$2 sm:$0xff]  ;;  %v1221_v33 = vsel %vm1199_vm5, %v1219_v28, %v3174_v62 }
 0x151   : > { %v1142_v42 = vsel %vm1113_vm6, %v1140_v38, %v1141_v39  ;;  %v1143_v4 = vsel %vm1113_vm6, %v1141_v39, %v2650_v47  ;;  %v1223_v38 = vrot.slane %v3124_v1, 2  ;;  %v1222_v39 = vrot.slane %v3122_v36, 2 }
 0x152   : > { %1174 = vrot.lane.b32.xlu1 %v1142_v42, %s2509_s8  ;;  %1176 = vrot.lane.b32.xlu0 %v1143_v4, %s2509_s8  ;;  %v1078_v8 = vadd.f32 %v1061_v45, %v1030_v59 }
 0x153   : > { %v1225_v4 = vsel %vm1199_vm5, %v1223_v38, %v3174_v62 }
 0x154   : > { %v983_v20 = vld [vmem:[#allocation2 + $0x128] ss:$2 sm:$0xff]  ;;  %v1015_v43 = vld [vmem:[#allocation2 + $0x129] ss:$2 sm:$0xff]  ;;  %v3162_v52 = vmul.f32 0.33333334, %v1078_v8 }
 0x155   : > { %v1031_v44 = vadd.f32 %v1015_v43, %v983_v20  ;;  %v1063_v49 = vld [vmem:[#allocation2 + $0x12a] ss:$2 sm:$0xff]  ;;  %v1227_v8 = vrot.slane %v3153_v31, 2  ;;  %v1226_v20 = vrot.slane %v3148_v14, 2 }
 0x156   : > { %v1144_v24 = vrot.slane %v3162_v52, 1 }
 0x157   : > { %v1079_v51 = vadd.f32 %v1063_v49, %v1031_v44  ;;  %v1229_v49 = vsel %vm1199_vm5, %v1227_v8, %v3174_v62 }
 0x159   : > { %v3164_v55 = vmul.f32 0.33333334, %v1079_v51 }
 0x15b   : > { %v1145_v57 = vrot.slane %v3164_v55, 1 }
 0x15d   : > { %v1146_v61 = vsel %vm1113_vm6, %v1144_v24, %v1145_v57  ;;  %v1147_v30 = vsel %vm1113_vm6, %v1145_v57, %v2650_v47  ;;  %vm3191_vm6 = vmneg %vm912_vm4  ;;  %v1231_v24 = vrot.slane %v3164_v55, 2  ;;  %v1230_v57 = vrot.slane %v3162_v52, 2 }
 0x15e   : > { %1178 = vrot.lane.b32.xlu1 %v1146_v61, %s2509_s8  ;;  %1180 = vrot.lane.b32.xlu0 %v1147_v30, %s2509_s8 }
 0x18c   : > { %v1149_v50 = vpop.permute.xlu0 %1148 }
 0x18d   : > { %v1234_v63 = vsel %vm912_vm4, %v2889_v25, %v1149_v50  ;;  %v1233_v50 = vsel %vm1199_vm5, %v1231_v24, %v3174_v62 }
 0x18e   : > { %1379 = vmatmul.mubr.f32.vlgmr.msra.gmra.mrb[0].mxu1 %v1234_v63 }
 0x18f   : > { %2045 = vmatprep.mubr.msk.f32.mxu1 %vm912_vm4, %v1204_v16  ;;  %v1741_v16 = vld [vmem:[%s3419_s3 + $0x8] sm:$0xff] }
 0x190   : > { %v1151_v47 = vpop.permute.xlu0 %1150 }
 0x191   : > { %v1235_v41 = vsel %vm912_vm4, %v2898_v56, %v1151_v47  ;;  %v1208_v56 = vsel %vm1199_vm5, %v1206_v6, %v1207_v46  ;;  %v1744_v46 = vld [vmem:[%s3419_s3 + $0x20] sm:$0xff]  ;;  %v1746_v6 = vld [vmem:[%s3419_s3 + $0x30] sm:$0xff] }
 0x192   : > { %1384 = vmatmul.mubr.f32.gmra.mrb[2].mxu1 %v1235_v41 }
 0x193   : > { %2046 = vmatprep.mubr.msk.f32.mxu1 %vm912_vm4, %v3174_v62 }
 0x196   : > { %2048 = vmatmul.mubr.msk.f32.gmra.mrb[4].mxu1 %vm3191_vm6, %v3186_v11 }
 0x197   : > { %2049 = vmatprep.mubr.msk.f32.mxu1 %vm912_vm4, %v1208_v56  ;;  %v1747_v56 = vld [vmem:[%s3419_s3 + $0x38] sm:$0xff] }
 0x199   : > { %v1155_v12 = vpop.permute.xlu1 %1154  ;;  %v1157_v15 = vpop.permute.xlu0 %1156 }
 0x19a   : > { %v1237_v3 = vsel %vm912_vm4, %v2971_v2, %v1155_v12  ;;  %v1238_v60 = vsel %vm912_vm4, %v2981_v10, %v1157_v15  ;;  %v1212_v2 = vsel %vm1199_vm5, %v1210_v18, %v1211_v32  ;;  %v2346_v12 = vpack.c.bf16 %v1747_v56, %v1746_v6  ;;  %v1749_v15 = vld [vmem:[%s3419_s3 + $0x48] sm:$0xff]  ;;  %v1751_v32 = vld [vmem:[%s3419_s3 + $0x58] sm:$0xff] }
 0x19b   : > { %1394 = vmatmul.mubr.f32.gmra.mrb[6].mxu1 %v1237_v3  ;;  %v1748_v3 = vld [vmem:[%s3419_s3 + $0x40] sm:$0xff] }
 0x19c   : > { %2050 = vmatprep.mubr.msk.f32.mxu1 %vm912_vm4, %v1209_v48  ;;  %v2350_v48 = vpack.c.bf16 %v1749_v15, %v1748_v3 }
 0x19f   : > { %1399 = vmatmul.mubr.f32.gmra.mrb[8].mxu1 %v1238_v60  ;;  %v1750_v60 = vld [vmem:[%s3419_s3 + $0x50] sm:$0xff] }
 0x1a0   : > { %2051 = vmatprep.mubr.msk.f32.mxu1 %vm912_vm4, %v3174_v62  ;;  %v2354_v18 = vpack.c.bf16 %v1751_v32, %v1750_v60 }
 0x1a3   : > { %2053 = vmatmul.mubr.msk.f32.gmra.mrb[10].mxu1 %vm3191_vm6, %v3186_v11 }
 0x1a4   : > { %2054 = vmatprep.mubr.msk.f32.mxu1 %vm912_vm4, %v1212_v2  ;;  %v3348_v2 = vld [vmem:[%s3420_s4 + $0x1] ss:$0 sm:$0xff] }
 0x1a7   : > { %v1159_v17 = vpop.permute.xlu1 %1158  ;;  %v1161_v21 = vpop.permute.xlu0 %1160 }
 0x1a8   : > { %v1239_v10 = vsel %vm912_vm4, %v3031_v7, %v1159_v17  ;;  %v1240_v23 = vsel %vm912_vm4, %v3046_v40, %v1161_v21  ;;  %v1216_v7 = vsel %vm1199_vm5, %v1214_v26, %v1215_v53 }
 0x1a9   : > { %1409 = vmatmul.mubr.f32.gmra.mrb[12].mxu1 %v1239_v10 }
 0x1aa   : > { %2055 = vmatprep.mubr.msk.f32.mxu1 %vm912_vm4, %v1213_v22 }
 0x1ad   : > { %1414 = vmatmul.mubr.f32.gmra.mrb[14].mxu1 %v1240_v23 }
 0x1ae   : > { %2056 = vmatprep.mubr.msk.f32.mxu1 %vm912_vm4, %v3174_v62 }
 0x1b0   : > { %v1163_v0 = vpop.permute.xlu1 %1162  ;;  %v1165_v58 = vpop.permute.xlu0 %1164 }
 0x1b1   : > { %2058 = vmatmul.mubr.msk.f32.gmra.mrb[16].mxu1 %vm3191_vm6, %v3186_v11  ;;  %v1241_v40 = vsel %vm912_vm4, %v3080_v5, %v1163_v0  ;;  %v1242_v9 = vsel %vm912_vm4, %v3088_v34, %v1165_v58  ;;  %v1220_v5 = vsel %vm1199_vm5, %v1218_v54, %v1219_v28 }
 0x1b2   : > { %2059 = vmatprep.mubr.msk.f32.mxu1 %vm912_vm4, %v1216_v7 }
 0x1b5   : > { %1424 = vmatmul.mubr.f32.gmra.mrb[18].mxu1 %v1241_v40 }
 0x1b6   : > { %2060 = vmatprep.mubr.msk.f32.mxu1 %vm912_vm4, %v1217_v27 }
 0x1b7   : > { %v1167_v29 = vpop.permute.xlu1 %1166  ;;  %v1169_v37 = vpop.permute.xlu0 %1168 }
 0x1b8   : > { %v1243_v34 = vsel %vm912_vm4, %v3111_v13, %v1167_v29  ;;  %v1244_v35 = vsel %vm912_vm4, %v3113_v19, %v1169_v37  ;;  %v1224_v13 = vsel %vm1199_vm5, %v1222_v39, %v1223_v38 }
 0x1b9   : > { %1429 = vmatmul.mubr.f32.gmra.mrb[20].mxu1 %v1242_v9 }
 0x1ba   : > { %2061 = vmatprep.mubr.msk.f32.mxu1 %vm912_vm4, %v3174_v62 }
 0x1bb   : > { %v1171_v59 = vpop.permute.xlu1 %1170  ;;  %v1173_v42 = vpop.permute.xlu0 %1172 }
 0x1bc   : > { %v1245_v19 = vsel %vm912_vm4, %v3122_v36, %v1171_v59  ;;  %v1246_v45 = vsel %vm912_vm4, %v3124_v1, %v1173_v42  ;;  %v1228_v36 = vsel %vm1199_vm5, %v1226_v20, %v1227_v8 }
 0x1bd   : > { %2063 = vmatmul.mubr.msk.f32.gmra.mrb[22].mxu1 %vm3191_vm6, %v3186_v11 }
 0x1be   : > { %2064 = vmatprep.mubr.msk.f32.mxu1 %vm912_vm4, %v1220_v5 }
 0x1c1   : > { %1439 = vmatmul.mubr.f32.gmra.mrb[24].mxu1 %v1243_v34 }
 0x1c2   : > { %2065 = vmatprep.mubr.msk.f32.mxu1 %vm912_vm4, %v1221_v33 }
 0x1c4   : > { %v1175_v43 = vpop.permute.xlu1 %1174  ;;  %v1177_v44 = vpop.permute.xlu0 %1176 }
 0x1c5   : > { %1444 = vmatmul.mubr.f32.gmra.mrb[26].mxu1 %v1244_v35  ;;  %v1247_v1 = vsel %vm912_vm4, %v3148_v14, %v1175_v43  ;;  %v1248_v51 = vsel %vm912_vm4, %v3153_v31, %v1177_v44  ;;  %v1232_v14 = vsel %vm1199_vm5, %v1230_v57, %v1231_v24 }
 0x1c6   : > { %2066 = vmatprep.mubr.msk.f32.mxu1 %vm912_vm4, %v3174_v62 }
 0x1c9   : > { %2068 = vmatmul.mubr.msk.f32.gmra.mrb[28].mxu1 %vm3191_vm6, %v3186_v11 }
 0x1ca   : > { %2069 = vmatprep.mubr.msk.f32.mxu1 %vm912_vm4, %v1224_v13 }
 0x1cd   : > { %1454 = vmatmul.mubr.f32.gmra.mrb[30].mxu1 %v1245_v19 }
 0x1ce   : > { %2070 = vmatprep.mubr.msk.f32.mxu1 %vm912_vm4, %v1225_v4 }
 0x1d0   : > { %v1179_v61 = vpop.permute.xlu1 %1178  ;;  %v1181_v30 = vpop.permute.xlu0 %1180 }
 0x1d1   : > { %1459 = vmatmul.mubr.f32.gmra.mrb[32].mxu1 %v1246_v45  ;;  %v1249_v31 = vsel %vm912_vm4, %v3162_v52, %v1179_v61  ;;  %v1250_v63 = vsel %vm912_vm4, %v3164_v55, %v1181_v30  ;;  %v1740_v52 = vld [vmem:[%s3419_s3] sm:$0xff]  ;;  %v1742_v55 = vld [vmem:[%s3419_s3 + $0x10] sm:$0xff] }
 0x1d2   : > { %2071 = vmatprep.mubr.msk.f32.mxu1 %vm912_vm4, %v3174_v62  ;;  %v2334_v47 = vpack.c.bf16 %v1741_v16, %v1740_v52 }
 0x1d4   : > { %2335 = vmatprep.subr.bf16.mxu0 %v2334_v47 }
 0x1d5   : > { %2073 = vmatmul.mubr.msk.f32.gmra.mrb[34].mxu1 %vm3191_vm6, %v3186_v11  ;;  %2337 = vmatpush3.bf16.msra.mxu0 %v2334_v47 }
 0x1d6   : > { %2074 = vmatprep.mubr.msk.f32.mxu1 %vm912_vm4, %v1228_v36 }
 0x1d9   : > { %1469 = vmatmul.mubr.f32.gmra.mrb[36].mxu1 %v1247_v1 }
 0x1da   : > { %2075 = vmatprep.mubr.msk.f32.mxu1 %vm912_vm4, %v1229_v49 }
 0x1dd   : > { %1474 = vmatmul.mubr.f32.gmra.mrb[38].mxu1 %v1248_v51 }
 0x1de   : > { %2076 = vmatprep.mubr.msk.f32.mxu1 %vm912_vm4, %v3174_v62 }
 0x1e1   : > { %2078 = vmatmul.mubr.msk.f32.gmra.mrb[40].mxu1 %vm3191_vm6, %v3186_v11 }
 0x1e2   : > { %2079 = vmatprep.mubr.msk.f32.mxu1 %vm912_vm4, %v1232_v14 }
 0x1e5   : > { %1484 = vmatmul.mubr.f32.gmra.mrb[42].mxu1 %v1249_v31 }
 0x1e6   : > { %2080 = vmatprep.mubr.msk.f32.mxu1 %vm912_vm4, %v1233_v50 }
 0x1e9   : > { %1489 = vmatmul.mubr.f32.gmra.mrb[44].mxu1 %v1250_v63 }
 0x1ea   : > { %2081 = vmatprep.mubr.msk.f32.mxu1 %vm912_vm4, %v3174_v62  ;;  %v1743_v62 = vld [vmem:[%s3419_s3 + $0x18] sm:$0xff]  ;;  %vm1643_vm4 = vcmask 785408  }
 0x1eb   : > { %v2338_v41 = vpack.c.bf16 %v1743_v62, %v1742_v55 }
 0x1ed   : > { %2083 = vmatmul.mubr.msk.f32.gmra.mrb[46].mxu1 %vm3191_vm6, %v3186_v11  ;;  %2339 = vmatprep.subr.bf16.mxu0 %v2338_v41  ;;  %v1745_v11 = vld [vmem:[%s3419_s3 + $0x28] sm:$0xff] }
 0x1ee   : > { %2341 = vmatpush3.bf16.msra.mxu0 %v2338_v41  ;;  %v2342_v25 = vpack.c.bf16 %v1745_v11, %v1744_v46 }
 0x1f0   : > { %2343 = vmatprep.subr.bf16.mxu0 %v2342_v25 }
 0x1f2   : > { %2345 = vmatpush3.bf16.msra.mxu0 %v2342_v25 }
 0x1f3   : > { %2347 = vmatprep.subr.bf16.mxu0 %v2346_v12 }
 0x1f6   : > { %2349 = vmatpush3.bf16.msra.mxu0 %v2346_v12 }
 0x1f7   : > { %2351 = vmatprep.subr.bf16.mxu0 %v2350_v48 }
 0x1fa   : > { %2353 = vmatpush3.bf16.msra.mxu0 %v2350_v48 }
 0x1fb   : > { %2355 = vmatprep.subr.bf16.mxu0 %v2354_v18 }
 0x1fe   : > { %2357 = vmatpush3.bf16.msra.mxu0 %v2354_v18 }
 0x261   : > { %v1380_v17 = vpop.f32.mrb[0].mxu1 }
 0x262   : > { %v1381_v10 = vadd.f32 %v3348_v2, %v1380_v17  ;;  %v1382_v21 = vpop.f32.mrb[1].mxu1 }
 0x264   : > { %v1523_v22 = vmin.f32 %v1381_v10, 0.0  ;;  %vm1499_vm5 = vcmp.gt.f32.partialorder %v1381_v10, 0.0 }
 0x265   : > { %v1385_v23 = vpop.f32.mrb[2].mxu1 }
 0x266   : > { %v1547_v53 = vmul.f32 1.442695, %v1523_v22  ;;  %v1386_v26 = vadd.f32 %v3348_v2, %v1385_v23  ;;  %v1387_v0 = vpop.f32.mrb[3].mxu1 }
 0x268   : > { %2451 = vpow2.f32 %v1547_v53  ;;  %v1524_v7 = vmin.f32 %v1386_v26, 0.0  ;;  %vm1500_vm3 = vcmp.gt.f32.partialorder %v1386_v26, 0.0 }
 0x269   : > { %v1390_v40 = vpop.f32.mrb[4].mxu1 }
 0x26a   : > { %v1549_v58 = vmul.f32 1.442695, %v1524_v7  ;;  %v1391_v27 = vadd.f32 %v3348_v2, %v1390_v40  ;;  %v1392_v9 = vpop.f32.mrb[5].mxu1 }
 0x26c   : > { %2453 = vpow2.f32 %v1549_v58  ;;  %v1525_v28 = vmin.f32 %v1391_v27, 0.0  ;;  %vm1501_vm7 = vcmp.gt.f32.partialorder %v1391_v27, 0.0 }
 0x26e   : > { %v1551_v54 = vmul.f32 1.442695, %v1525_v28  ;;  %v1395_v29 = vpop.f32.mrb[6].mxu1 }
 0x26f   : > { %v1396_v5 = vadd.f32 %v3348_v2, %v1395_v29  ;;  %v1397_v34 = vpop.f32.mrb[7].mxu1 }
 0x270   : > { %2455 = vpow2.f32 %v1551_v54 }
 0x271   : > { %v1526_v37 = vmin.f32 %v1396_v5, 0.0  ;;  %vm1502_vm8 = vcmp.gt.f32.partialorder %v1396_v5, 0.0 }
 0x272   : > { %v2452_v33 = vpop.eup %2451  ;;  %v1400_v35 = vpop.f32.mrb[8].mxu1 }
 0x273   : > { %v2084_v38 = vadd.f32 -1.0, %v2452_v33  ;;  %v1553_v39 = vmul.f32 1.442695, %v1526_v37  ;;  %v1401_v59 = vadd.f32 %v3348_v2, %v1400_v35  ;;  %v1402_v13 = vpop.f32.mrb[9].mxu1 }
 0x275   : > { %v1619_v19 = vsel %vm1499_vm5, %v1381_v10, %v2084_v38  ;;  %2457 = vpow2.f32 %v1553_v39  ;;  %v1527_v42 = vmin.f32 %v1401_v59, 0.0  ;;  %vm1503_vm9 = vcmp.gt.f32.partialorder %v1401_v59, 0.0 }
 0x276   : > { %v2454_v4 = vpop.eup %2453  ;;  %1644 = vst.msk [vmem:[#allocation3] sm:$0xff] %vm1643_vm4, %v1619_v19  ;;  %v1405_v45 = vpop.f32.mrb[10].mxu1 }
 0x277   : > { %v2085_v8 = vadd.f32 -1.0, %v2454_v4  ;;  %v1555_v20 = vmul.f32 1.442695, %v1527_v42  ;;  %v1406_v43 = vadd.f32 %v3348_v2, %v1405_v45  ;;  %v1407_v36 = vpop.f32.mrb[11].mxu1 }
 0x279   : > { %v1620_v1 = vsel %vm1500_vm3, %v1386_v26, %v2085_v8  ;;  %2459 = vpow2.f32 %v1555_v20  ;;  %v1528_v44 = vmin.f32 %v1406_v43, 0.0  ;;  %vm1504_vm10 = vcmp.gt.f32.partialorder %v1406_v43, 0.0 }
 0x27a   : > { %v2456_v49 = vpop.eup %2455  ;;  %1645 = vst.msk [vmem:[#allocation3 + $0x8] sm:$0xff] %vm1643_vm4, %v1620_v1 }
 0x27b   : > { %v2086_v51 = vadd.f32 -1.0, %v2456_v49  ;;  %v1557_v24 = vmul.f32 1.442695, %v1528_v44 }
 0x27c   : > { %v1410_v57 = vpop.f32.mrb[12].mxu1 }
 0x27d   : > { %v1411_v61 = vadd.f32 %v3348_v2, %v1410_v57  ;;  %v1412_v14 = vpop.f32.mrb[13].mxu1  ;;  %v1621_v31 = vsel %vm1501_vm7, %v1391_v27, %v2086_v51  ;;  %2461 = vpow2.f32 %v1557_v24 }
 0x27e   : > { %1646 = vst.msk [vmem:[#allocation3 + $0x10] sm:$0xff] %vm1643_vm4, %v1621_v31 }
 0x27f   : > { %v1529_v30 = vmin.f32 %v1411_v61, 0.0  ;;  %v2458_v50 = vpop.eup %2457  ;;  %vm1505_vm11 = vcmp.gt.f32.partialorder %v1411_v61, 0.0 }
 0x280   : > { %v1415_v63 = vpop.f32.mrb[14].mxu1  ;;  %v2087_v52 = vadd.f32 -1.0, %v2458_v50 }
 0x281   : > { %v1559_v16 = vmul.f32 1.442695, %v1529_v30  ;;  %v1416_v47 = vadd.f32 %v3348_v2, %v1415_v63  ;;  %v1417_v55 = vpop.f32.mrb[15].mxu1  ;;  %v1668_v46 = vld [vmem:[#allocation3] ss:$2 sm:$0xff] }
 0x282   : > { %v1622_v62 = vsel %vm1502_vm8, %v1396_v5, %v2087_v52  ;;  %v1684_v11 = vld [vmem:[#allocation3 + $0x1] ss:$2 sm:$0xff] }
 0x283   : > { %2463 = vpow2.f32 %v1559_v16  ;;  %v1530_v41 = vmin.f32 %v1416_v47, 0.0  ;;  %v2460_v25 = vpop.eup %2459  ;;  %1647 = vst.msk [vmem:[#allocation3 + $0x18] sm:$0xff] %vm1643_vm4, %v1622_v62  ;;  %v1699_v48 = vadd.f32 %v1684_v11, %v1668_v46  ;;  %vm1506_vm12 = vcmp.gt.f32.partialorder %v1416_v47, 0.0 }
 0x284   : > { %v1420_v6 = vpop.f32.mrb[16].mxu1  ;;  %v2088_v56 = vadd.f32 -1.0, %v2460_v25 }
 0x285   : > { %v1561_v12 = vmul.f32 1.442695, %v1530_v41  ;;  %v1421_v3 = vadd.f32 %v3348_v2, %v1420_v6  ;;  %v1422_v15 = vpop.f32.mrb[17].mxu1  ;;  %v1708_v60 = vld [vmem:[#allocation3 + $0x2] ss:$2 sm:$0xff] }
 0x286   : > { %v1623_v32 = vsel %vm1503_vm9, %v1401_v59, %v2088_v56  ;;  %v1723_v21 = vadd.f32 %v1708_v60, %v1699_v48 }
 0x287   : > { %2465 = vpow2.f32 %v1561_v12  ;;  %v1531_v18 = vmin.f32 %v1421_v3, 0.0  ;;  %v2462_v17 = vpop.eup %2461  ;;  %1648 = vst.msk [vmem:[#allocation3 + $0x20] sm:$0xff] %vm1643_vm4, %v1623_v32  ;;  %vm1507_vm13 = vcmp.gt.f32.partialorder %v1421_v3, 0.0 }
 0x288   : > { %v1425_v10 = vpop.f32.mrb[18].mxu1  ;;  %v2089_v22 = vadd.f32 -1.0, %v2462_v17  ;;  %v1731_v0 = vmul.f32 0.33333334, %v1723_v21 }
 0x289   : > { %v1563_v23 = vmul.f32 1.442695, %v1531_v18  ;;  %v1426_v53 = vadd.f32 %v3348_v2, %v1425_v10  ;;  %v1427_v26 = vpop.f32.mrb[19].mxu1 }
 0x28a   : > { %v1624_v7 = vsel %vm1504_vm10, %v1406_v43, %v2089_v22  ;;  %2276 = vmatprep.mubr.msk.f32.mxu0 %vm1643_vm4, %v1731_v0 }
 0x28b   : > { %2467 = vpow2.f32 %v1563_v23  ;;  %v1532_v40 = vmin.f32 %v1426_v53, 0.0  ;;  %1649 = vst.msk [vmem:[#allocation3 + $0x28] sm:$0xff] %vm1643_vm4, %v1624_v7  ;;  %vm1508_vm14 = vcmp.gt.f32.partialorder %v1426_v53, 0.0 }
 0x28c   : > { %v1430_v58 = vpop.f32.mrb[20].mxu1 }
 0x28d   : > { %v2464_v27 = vpop.eup %2463  ;;  %v1565_v9 = vmul.f32 1.442695, %v1532_v40  ;;  %v1431_v28 = vadd.f32 %v3348_v2, %v1430_v58  ;;  %v1432_v54 = vpop.f32.mrb[21].mxu1 }
 0x28e   : > { %v2090_v29 = vadd.f32 -1.0, %v2464_v27  ;;  %v1670_v34 = vld [vmem:[#allocation3 + $0x18] ss:$2 sm:$0xff]  ;;  %v1686_v37 = vld [vmem:[#allocation3 + $0x19] ss:$2 sm:$0xff] }
 0x28f   : > { %2469 = vpow2.f32 %v1565_v9  ;;  %v1533_v5 = vmin.f32 %v1431_v28, 0.0  ;;  %v1700_v42 = vadd.f32 %v1686_v37, %v1670_v34  ;;  %vm1509_vm15 = vcmp.gt.f32.partialorder %v1431_v28, 0.0 }
 0x290   : > { %v1625_v33 = vsel %vm1505_vm11, %v1411_v61, %v2090_v29  ;;  %v1435_v35 = vpop.f32.mrb[22].mxu1 }
 0x291   : > { %v2466_v38 = vpop.eup %2465  ;;  %1650 = vst.msk [vmem:[#allocation3 + $0x30] sm:$0xff] %vm1643_vm4, %v1625_v33  ;;  %v1567_v39 = vmul.f32 1.442695, %v1533_v5  ;;  %v1436_v59 = vadd.f32 %v3348_v2, %v1435_v35  ;;  %v1437_v13 = vpop.f32.mrb[23].mxu1 }
 0x292   : > { %v2091_v19 = vadd.f32 -1.0, %v2466_v38  ;;  %v1710_v45 = vld [vmem:[#allocation3 + $0x1a] ss:$2 sm:$0xff] }
 0x293   : > { %2471 = vpow2.f32 %v1567_v39  ;;  %v1534_v4 = vmin.f32 %v1436_v59, 0.0  ;;  %v1724_v43 = vadd.f32 %v1710_v45, %v1700_v42  ;;  %vm1510_vm0 = vcmp.gt.f32.partialorder %v1436_v59, 0.0 }
 0x294   : > { %v1626_v8 = vsel %vm1506_vm12, %v1416_v47, %v2091_v19  ;;  %v1440_v20 = vpop.f32.mrb[24].mxu1 }
 0x295   : > { %v2468_v36 = vpop.eup %2467  ;;  %1651 = vst.msk [vmem:[#allocation3 + $0x38] sm:$0xff] %vm1643_vm4, %v1626_v8  ;;  %v1569_v1 = vmul.f32 1.442695, %v1534_v4  ;;  %v1441_v44 = vadd.f32 %v3348_v2, %v1440_v20  ;;  %v1442_v49 = vpop.f32.mrb[25].mxu1 }
 0x296   : > { %v2092_v51 = vadd.f32 -1.0, %v2468_v36  ;;  %v1732_v24 = vmul.f32 0.33333334, %v1724_v43 }
 0x297   : > { %2473 = vpow2.f32 %v1569_v1  ;;  %v1535_v57 = vmin.f32 %v1441_v44, 0.0  ;;  %vm1511_vm1 = vcmp.gt.f32.partialorder %v1441_v44, 0.0 }
 0x298   : > { %v1627_v61 = vsel %vm1507_vm13, %v1421_v3, %v2092_v51  ;;  %v1445_v14 = vpop.f32.mrb[26].mxu1  ;;  %2277 = vmatmul.mubr.msk.f32.vlgmr.msra.gmra.mrb[40].mxu0 %vm1643_vm4, %v1732_v24 }
 0x299   : > { %v2470_v31 = vpop.eup %2469  ;;  %1652 = vst.msk [vmem:[#allocation3 + $0x40] sm:$0xff] %vm1643_vm4, %v1627_v61  ;;  %v1571_v30 = vmul.f32 1.442695, %v1535_v57  ;;  %v1446_v50 = vadd.f32 %v3348_v2, %v1445_v14  ;;  %v1447_v63 = vpop.f32.mrb[27].mxu1 }
 0x29a   : > { %v2093_v52 = vadd.f32 -1.0, %v2470_v31 }
 0x29b   : > { %2475 = vpow2.f32 %v1571_v30  ;;  %v1536_v16 = vmin.f32 %v1446_v50, 0.0  ;;  %vm1512_vm2 = vcmp.gt.f32.partialorder %v1446_v50, 0.0 }
 0x29c   : > { %v1628_v47 = vsel %vm1508_vm14, %v1426_v53, %v2093_v52  ;;  %v1450_v55 = vpop.f32.mrb[28].mxu1  ;;  %v1672_v62 = vld [vmem:[#allocation3 + $0x30] ss:$2 sm:$0xff]  ;;  %v1688_v41 = vld [vmem:[#allocation3 + $0x31] ss:$2 sm:$0xff] }
 0x29d   : > { %v2472_v46 = vpop.eup %2471  ;;  %1653 = vst.msk [vmem:[#allocation3 + $0x48] sm:$0xff] %vm1643_vm4, %v1628_v47  ;;  %v1573_v11 = vmul.f32 1.442695, %v1536_v16  ;;  %v1451_v25 = vadd.f32 %v3348_v2, %v1450_v55  ;;  %v1452_v6 = vpop.f32.mrb[29].mxu1  ;;  %v1701_v3 = vadd.f32 %v1688_v41, %v1672_v62 }
 0x29e   : > { %v2094_v56 = vadd.f32 -1.0, %v2472_v46 }
 0x29f   : > { %2477 = vpow2.f32 %v1573_v11  ;;  %v1537_v12 = vmin.f32 %v1451_v25, 0.0  ;;  %vm1513_vm6 = vcmp.gt.f32.partialorder %v1451_v25, 0.0 }
 0x2a0   : > { %v1629_v15 = vsel %vm1509_vm15, %v1431_v28, %v2094_v56  ;;  %v1455_v48 = vpop.f32.mrb[30].mxu1  ;;  %v1712_v60 = vld [vmem:[#allocation3 + $0x32] ss:$2 sm:$0xff] }
 0x2a1   : > { %v2474_v32 = vpop.eup %2473  ;;  %1654 = vst.msk [vmem:[#allocation3 + $0x50] sm:$0xff] %vm1643_vm4, %v1629_v15  ;;  %v1575_v18 = vmul.f32 1.442695, %v1537_v12  ;;  %v1456_v17 = vadd.f32 %v3348_v2, %v1455_v48  ;;  %v1457_v10 = vpop.f32.mrb[31].mxu1  ;;  %v1725_v21 = vadd.f32 %v1712_v60, %v1701_v3 }
 0x2a2   : > { %v2095_v22 = vadd.f32 -1.0, %v2474_v32 }
 0x2a3   : > { %2479 = vpow2.f32 %v1575_v18  ;;  %v1538_v23 = vmin.f32 %v1456_v17, 0.0  ;;  %v1733_v53 = vmul.f32 0.33333334, %v1725_v21  ;;  %vm1514_vm5 = vcmp.gt.f32.partialorder %v1456_v17, 0.0 }
 0x2a4   : > { %v1630_v26 = vsel %vm1510_vm0, %v1436_v59, %v2095_v22  ;;  %v1460_v0 = vpop.f32.mrb[32].mxu1 }
 0x2a5   : > { %v2476_v7 = vpop.eup %2475  ;;  %1655 = vst.msk [vmem:[#allocation3 + $0x58] sm:$0xff] %vm1643_vm4, %v1630_v26  ;;  %v1577_v40 = vmul.f32 1.442695, %v1538_v23  ;;  %v1461_v58 = vadd.f32 %v3348_v2, %v1460_v0  ;;  %v1462_v27 = vpop.f32.mrb[33].mxu1  ;;  %2279 = vmatprep.mubr.msk.f32.mxu0 %vm1643_vm4, %v1733_v53 }
 0x2a6   : > { %v2096_v9 = vadd.f32 -1.0, %v2476_v7 }
 0x2a7   : > { %2481 = vpow2.f32 %v1577_v40  ;;  %v1539_v28 = vmin.f32 %v1461_v58, 0.0  ;;  %vm1515_vm3 = vcmp.gt.f32.partialorder %v1461_v58, 0.0 }
 0x2a8   : > { %v1631_v54 = vsel %vm1511_vm1, %v1441_v44, %v2096_v9  ;;  %v1465_v29 = vpop.f32.mrb[34].mxu1  ;;  %v1674_v5 = vld [vmem:[#allocation3 + $0x48] ss:$2 sm:$0xff]  ;;  %v1690_v34 = vld [vmem:[#allocation3 + $0x49] ss:$2 sm:$0xff] }
 0x2a9   : > { %v2478_v37 = vpop.eup %2477  ;;  %1656 = vst.msk [vmem:[#allocation3 + $0x60] sm:$0xff] %vm1643_vm4, %v1631_v54  ;;  %v1579_v33 = vmul.f32 1.442695, %v1539_v28  ;;  %v1466_v35 = vadd.f32 %v3348_v2, %v1465_v29  ;;  %v1467_v38 = vpop.f32.mrb[35].mxu1  ;;  %v1702_v13 = vadd.f32 %v1690_v34, %v1674_v5 }
 0x2aa   : > { %v2097_v39 = vadd.f32 -1.0, %v2478_v37 }
 0x2ab   : > { %2483 = vpow2.f32 %v1579_v33  ;;  %v1540_v59 = vmin.f32 %v1466_v35, 0.0  ;;  %vm1516_vm7 = vcmp.gt.f32.partialorder %v1466_v35, 0.0 }
 0x2ac   : > { %v1632_v19 = vsel %vm1512_vm2, %v1446_v50, %v2097_v39  ;;  %v1470_v42 = vpop.f32.mrb[36].mxu1  ;;  %v1714_v4 = vld [vmem:[#allocation3 + $0x4a] ss:$2 sm:$0xff] }
 0x2ad   : > { %v2480_v45 = vpop.eup %2479  ;;  %1657 = vst.msk [vmem:[#allocation3 + $0x68] sm:$0xff] %vm1643_vm4, %v1632_v19  ;;  %v1581_v8 = vmul.f32 1.442695, %v1540_v59  ;;  %v1471_v20 = vadd.f32 %v3348_v2, %v1470_v42  ;;  %v1472_v43 = vpop.f32.mrb[37].mxu1  ;;  %v1726_v36 = vadd.f32 %v1714_v4, %v1702_v13 }
 0x2ae   : > { %v2098_v1 = vadd.f32 -1.0, %v2480_v45 }
 0x2af   : > { %2485 = vpow2.f32 %v1581_v8  ;;  %v1541_v44 = vmin.f32 %v1471_v20, 0.0  ;;  %v1734_v49 = vmul.f32 0.33333334, %v1726_v36  ;;  %vm1517_vm8 = vcmp.gt.f32.partialorder %v1471_v20, 0.0 }
 0x2b0   : > { %v1633_v51 = vsel %vm1513_vm6, %v1451_v25, %v2098_v1  ;;  %v1475_v24 = vpop.f32.mrb[38].mxu1 }
 0x2b1   : > { %v2482_v57 = vpop.eup %2481  ;;  %1658 = vst.msk [vmem:[#allocation3 + $0x70] sm:$0xff] %vm1643_vm4, %v1633_v51  ;;  %v1583_v61 = vmul.f32 1.442695, %v1541_v44  ;;  %v1476_v14 = vadd.f32 %v3348_v2, %v1475_v24  ;;  %v1477_v31 = vpop.f32.mrb[39].mxu1  ;;  %2280 = vmatmul.mubr.msk.f32.gmra.mrb[42].mxu0 %vm1643_vm4, %v1734_v49 }
 0x2b2   : > { %v2099_v30 = vadd.f32 -1.0, %v2482_v57 }
 0x2b3   : > { %2487 = vpow2.f32 %v1583_v61  ;;  %v1542_v50 = vmin.f32 %v1476_v14, 0.0  ;;  %vm1518_vm9 = vcmp.gt.f32.partialorder %v1476_v14, 0.0 }
 0x2b4   : > { %v1634_v63 = vsel %vm1514_vm5, %v1456_v17, %v2099_v30  ;;  %v1480_v52 = vpop.f32.mrb[40].mxu1  ;;  %v1676_v16 = vld [vmem:[#allocation3 + $0x60] ss:$2 sm:$0xff]  ;;  %v1692_v47 = vld [vmem:[#allocation3 + $0x61] ss:$2 sm:$0xff] }
 0x2b5   : > { %v2484_v55 = vpop.eup %2483  ;;  %1659 = vst.msk [vmem:[#allocation3 + $0x78] sm:$0xff] %vm1643_vm4, %v1634_v63  ;;  %v1585_v62 = vmul.f32 1.442695, %v1542_v50  ;;  %v1481_v41 = vadd.f32 %v3348_v2, %v1480_v52  ;;  %v1482_v46 = vpop.f32.mrb[41].mxu1  ;;  %v1703_v6 = vadd.f32 %v1692_v47, %v1676_v16 }
 0x2b6   : > { %v2100_v11 = vadd.f32 -1.0, %v2484_v55 }
 0x2b7   : > { %2489 = vpow2.f32 %v1585_v62  ;;  %v1543_v25 = vmin.f32 %v1481_v41, 0.0  ;;  %vm1519_vm10 = vcmp.gt.f32.partialorder %v1481_v41, 0.0 }
 0x2b8   : > { %v1635_v56 = vsel %vm1515_vm3, %v1461_v58, %v2100_v11  ;;  %v1485_v12 = vpop.f32.mrb[42].mxu1  ;;  %v1716_v3 = vld [vmem:[#allocation3 + $0x62] ss:$2 sm:$0xff] }
 0x2b9   : > { %v2486_v15 = vpop.eup %2485  ;;  %1660 = vst.msk [vmem:[#allocation3 + $0x80] sm:$0xff] %vm1643_vm4, %v1635_v56  ;;  %v1587_v48 = vmul.f32 1.442695, %v1543_v25  ;;  %v1486_v60 = vadd.f32 %v3348_v2, %v1485_v12  ;;  %v1487_v32 = vpop.f32.mrb[43].mxu1  ;;  %v1727_v18 = vadd.f32 %v1716_v3, %v1703_v6 }
 0x2ba   : > { %v2101_v17 = vadd.f32 -1.0, %v2486_v15 }
 0x2bb   : > { %2491 = vpow2.f32 %v1587_v48  ;;  %v1544_v10 = vmin.f32 %v1486_v60, 0.0  ;;  %v1735_v21 = vmul.f32 0.33333334, %v1727_v18  ;;  %vm1520_vm11 = vcmp.gt.f32.partialorder %v1486_v60, 0.0 }
 0x2bc   : > { %v1636_v22 = vsel %vm1516_vm7, %v1466_v35, %v2101_v17  ;;  %v1490_v23 = vpop.f32.mrb[44].mxu1 }
 0x2bd   : > { %v2488_v53 = vpop.eup %2487  ;;  %1661 = vst.msk [vmem:[#allocation3 + $0x88] sm:$0xff] %vm1643_vm4, %v1636_v22  ;;  %v1589_v26 = vmul.f32 1.442695, %v1544_v10  ;;  %v1491_v0 = vadd.f32 %v3348_v2, %v1490_v23  ;;  %v1492_v7 = vpop.f32.mrb[45].mxu1  ;;  %2282 = vmatprep.mubr.msk.f32.mxu0 %vm1643_vm4, %v1735_v21 }
 0x2be   : > { %v2102_v40 = vadd.f32 -1.0, %v2488_v53 }
 0x2bf   : > { %2493 = vpow2.f32 %v1589_v26  ;;  %v1545_v58 = vmin.f32 %v1491_v0, 0.0  ;;  %vm1521_vm12 = vcmp.gt.f32.partialorder %v1491_v0, 0.0 }
 0x2c0   : > { %v1637_v27 = vsel %vm1517_vm8, %v1471_v20, %v2102_v40  ;;  %v1495_v9 = vpop.f32.mrb[46].mxu1  ;;  %v1678_v28 = vld [vmem:[#allocation3 + $0x78] ss:$2 sm:$0xff]  ;;  %v1694_v54 = vld [vmem:[#allocation3 + $0x79] ss:$2 sm:$0xff] }
 0x2c1   : > { %v2490_v29 = vpop.eup %2489  ;;  %1662 = vst.msk [vmem:[#allocation3 + $0x90] sm:$0xff] %vm1643_vm4, %v1637_v27  ;;  %v1591_v5 = vmul.f32 1.442695, %v1545_v58  ;;  %v1496_v34 = vadd.f32 %v3348_v2, %v1495_v9  ;;  %v1497_v37 = vpop.f32.mrb[47].mxu1  ;;  %v1704_v38 = vadd.f32 %v1694_v54, %v1678_v28 }
 0x2c2   : > { %v2103_v33 = vadd.f32 -1.0, %v2490_v29 }
 0x2c3   : > { %2495 = vpow2.f32 %v1591_v5  ;;  %v1546_v35 = vmin.f32 %v1496_v34, 0.0  ;;  %vm1522_vm13 = vcmp.gt.f32.partialorder %v1496_v34, 0.0 }
 0x2c4   : > { %v1638_v39 = vsel %vm1518_vm9, %v1476_v14, %v2103_v33  ;;  %v1718_v59 = vld [vmem:[#allocation3 + $0x7a] ss:$2 sm:$0xff] }
 0x2c5   : > { %v2492_v13 = vpop.eup %2491  ;;  %1663 = vst.msk [vmem:[#allocation3 + $0x98] sm:$0xff] %vm1643_vm4, %v1638_v39  ;;  %v1593_v19 = vmul.f32 1.442695, %v1546_v35  ;;  %v1728_v42 = vadd.f32 %v1718_v59, %v1704_v38 }
 0x2c6   : > { %v2104_v4 = vadd.f32 -1.0, %v2492_v13 }
 0x2c7   : > { %2497 = vpow2.f32 %v1593_v19  ;;  %v1736_v45 = vmul.f32 0.33333334, %v1728_v42 }
 0x2c8   : > { %v1639_v8 = vsel %vm1519_vm10, %v1481_v41, %v2104_v4  ;;  %v2108_v41 = vld [vmem:[%s3420_s4 + $0x2] ss:$0 sm:$0xff] }
 0x2c9   : > { %v2494_v20 = vpop.eup %2493  ;;  %1664 = vst.msk [vmem:[#allocation3 + $0xa0] sm:$0xff] %vm1643_vm4, %v1639_v8  ;;  %2283 = vmatmul.mubr.msk.f32.gmra.mrb[44].mxu0 %vm1643_vm4, %v1736_v45 }
 0x2ca   : > { %v2105_v2 = vadd.f32 -1.0, %v2494_v20 }
 0x2cc   : > { %v1640_v43 = vsel %vm1520_vm11, %v1486_v60, %v2105_v2  ;;  %v1680_v36 = vld [vmem:[#allocation3 + $0x90] ss:$2 sm:$0xff]  ;;  %v1696_v1 = vld [vmem:[#allocation3 + $0x91] ss:$2 sm:$0xff] }
 0x2cd   : > { %v2496_v44 = vpop.eup %2495  ;;  %1665 = vst.msk [vmem:[#allocation3 + $0xa8] sm:$0xff] %vm1643_vm4, %v1640_v43  ;;  %v1705_v51 = vadd.f32 %v1696_v1, %v1680_v36 }
 0x2ce   : > { %v2106_v49 = vadd.f32 -1.0, %v2496_v44 }
 0x2d0   : > { %v1641_v24 = vsel %vm1521_vm12, %v1491_v0, %v2106_v49  ;;  %v1720_v57 = vld [vmem:[#allocation3 + $0x92] ss:$2 sm:$0xff] }
 0x2d1   : > { %v2498_v61 = vpop.eup %2497  ;;  %1666 = vst.msk [vmem:[#allocation3 + $0xb0] sm:$0xff] %vm1643_vm4, %v1641_v24  ;;  %v1729_v14 = vadd.f32 %v1720_v57, %v1705_v51 }
 0x2d2   : > { %v2107_v31 = vadd.f32 -1.0, %v2498_v61 }
 0x2d3   : > { %v1737_v30 = vmul.f32 0.33333334, %v1729_v14 }
 0x2d4   : > { %v1642_v50 = vsel %vm1522_vm13, %v1496_v34, %v2107_v31 }
 0x2d5   : > { %1667 = vst.msk [vmem:[#allocation3 + $0xb8] sm:$0xff] %vm1643_vm4, %v1642_v50  ;;  %2285 = vmatprep.mubr.msk.f32.mxu0 %vm1643_vm4, %v1737_v30 }
 0x2d8   : > { %v1682_v63 = vld [vmem:[#allocation3 + $0xa8] ss:$2 sm:$0xff]  ;;  %v1698_v52 = vld [vmem:[#allocation3 + $0xa9] ss:$2 sm:$0xff] }
 0x2d9   : > { %v1706_v16 = vadd.f32 %v1698_v52, %v1682_v63 }
 0x2dc   : > { %v1722_v47 = vld [vmem:[#allocation3 + $0xaa] ss:$2 sm:$0xff] }
 0x2dd   : > { %v1730_v55 = vadd.f32 %v1722_v47, %v1706_v16 }
 0x2df   : > { %v1738_v62 = vmul.f32 0.33333334, %v1730_v55 }
 0x2e1   : > { %2286 = vmatmul.mubr.msk.f32.gmra.mrb[46].mxu0 %vm1643_vm4, %v1738_v62 }
 0x36b   : > { %v2278_v46 = vpop.f32.mrb[40].mxu0 }
 0x36c   : > { %v1852_v11 = vadd.f32 %v2278_v46, %v2108_v41  ;;  %v1846_v25 = vpop.f32.mrb[41].mxu0 }
 0x36d   : > { %v1847_v6 = vadd.f32 %v2108_v41, %v1846_v25 }
 0x36e   : > { %1886 = vst [vmem:[%s231_s23 + $0x8] sm:$0xff] %v1852_v11 }
 0x36f   : > { %1885 = vst [vmem:[%s231_s23] sm:$0xff] %v1847_v6 }
 0x384   : > { %v2281_v56 = vpop.f32.mrb[42].mxu0 }
 0x385   : > { %v1862_v12 = vadd.f32 %v2281_v56, %v2108_v41  ;;  %v1856_v3 = vpop.f32.mrb[43].mxu0 }
 0x386   : > { %v1857_v15 = vadd.f32 %v2108_v41, %v1856_v3 }
 0x387   : > { %1888 = vst [vmem:[%s231_s23 + $0x18] sm:$0xff] %v1862_v12 }
 0x388   : > { %1887 = vst [vmem:[%s231_s23 + $0x10] sm:$0xff] %v1857_v15 }
 0x39c   : > { %v2284_v48 = vpop.f32.mrb[44].mxu0 }
 0x39d   : > { %v1872_v60 = vadd.f32 %v2284_v48, %v2108_v41  ;;  %v1866_v32 = vpop.f32.mrb[45].mxu0 }
 0x39e   : > { %v1867_v18 = vadd.f32 %v2108_v41, %v1866_v32 }
 0x39f   : > { %1890 = vst [vmem:[%s231_s23 + $0x28] sm:$0xff] %v1872_v60 }
 0x3a0   : > { %1889 = vst [vmem:[%s231_s23 + $0x20] sm:$0xff] %v1867_v18 }
 0x3b4   : > { %v2287_v17 = vpop.f32.mrb[46].mxu0 }
 0x3b5   : > { %v1882_v10 = vadd.f32 %v2287_v17, %v2108_v41  ;;  %v1876_v21 = vpop.f32.mrb[47].mxu0 }
 0x3b6   : > { %v1877_v22 = vadd.f32 %v2108_v41, %v1876_v21 }
 0x3b7   : > { %1892 = vst [vmem:[%s231_s23 + $0x38] sm:$0xff] %v1882_v10 }
 0x3b8   : > { %1891 = vst [vmem:[%s231_s23 + $0x30] sm:$0xff] %v1877_v22 }
 0x3b9 PF: > { %s15_s18 = sadd.s32 1, %s2505_s18  }
 0x3ba   : > { %p12_p4 = scmp.ge.s32.totalorder %s15_s18, 4  }
 0x3bc   :  { %14 = sbr.rel (!%p12_p4) target bundleno = 1 (0x1), region = 140 }

</bundles_post_ra>
